<compile_context>
chip_gen: v6e
topology: v6e:2x2x1
jax: 0.10.0
libtpu: 0.0.40
codegen_flags: <defaults>
</compile_context>

<pallas_src>
import functools

import jax
import jax.numpy as jnp
from jax import lax
from jax.experimental import pallas as pl
from jax.experimental.pallas import tpu as pltpu


# ---------------------------------------------------------------------------
# Fused kernel, grid=(L,): one grid step per LSTM layer + FC epilogue on the
# last step.
#   inputs : x2d (T*B, H) bf16 (zero-padded from D), h0/c0 block (B, H) f32,
#            per-layer w_ih/w_hh (H, 4H) bf16, b (1, 4H) f32 (streamed),
#            w_fc (H, Vp) bf16, b_fc (1, Vp) f32
#   outputs: logits2d (T*B, Vp) f32 (written on last step), hN/cN (B, H) f32
#   scratch: xproj (T*B, 4H) bf16, out (T*B, H) bf16   (persist across steps)
# ---------------------------------------------------------------------------
def _lstm_fc_kernel(T, B, H, L,
                    x_ref, h0_ref, c0_ref, wih_ref, whh_ref, b_ref,
                    wfc_ref, bfc_ref,
                    logits_ref, hN_ref, cN_ref,
                    xproj_ref, out_ref):
    l = pl.program_id(0)

    # Layer 0 consumes the (zero-padded to width H) embeddings; later layers
    # consume the previous layer's output already sitting in `out_ref`.
    @pl.when(l == 0)
    def _():
        out_ref[...] = x_ref[...]

    # Hoisted input projection: one big (T*B, H) @ (H, 4H) MXU matmul per
    # layer (legal because layers run sequentially over the full sequence).
    xproj_ref[...] = jnp.dot(
        out_ref[...], wih_ref[...],
        preferred_element_type=jnp.float32).astype(jnp.bfloat16)

    # Bias added in f32 at gate time (kept out of the bf16 xproj store).
    bias = jnp.broadcast_to(b_ref[...], (B, 4 * H))

    # -- Recurrence: per step only h @ w_hh + elementwise gate math.
    def step(t, carry):
        h, c = carry                                  # f32 (B, H) carries
        row = pl.multiple_of(t * B, B)
        gates = (xproj_ref[pl.ds(row, B), :]
                 + jnp.dot(h.astype(jnp.bfloat16), whh_ref[...],
                           preferred_element_type=jnp.float32)
                 + bias)                              # (B, 4H) f32, order i|f|o|g
        ifo = jax.nn.sigmoid(gates[:, :3 * H])        # single EUP pass: i, f, o
        i_g = ifo[:, :H]
        f_g = ifo[:, H:2 * H]
        o_g = ifo[:, 2 * H:]
        g_g = jnp.tanh(gates[:, 3 * H:])
        c_new = f_g * c + i_g * g_g
        h_new = o_g * jnp.tanh(c_new)
        out_ref[pl.ds(row, B), :] = h_new.astype(jnp.bfloat16)
        return (h_new, c_new)

    # Unrolled recurrence: the step body is tiny (an (B,H)@(H,4H) matmul plus
    # a handful of VPU/EUP ops), so expose it across steps to the scheduler.
    unroll = T if T <= 16 else 8
    hf, cf = lax.fori_loop(0, T, step, (h0_ref[...], c0_ref[...]),
                           unroll=unroll)
    hN_ref[...] = hf
    cN_ref[...] = cf
    # TODO(synk): nn.LSTM inter-layer dropout(p=0.2) is train-only; forward
    # here follows eval semantics (no dropout).

    # -- Fused FC epilogue on the last layer: out is already VMEM-resident.
    @pl.when(l == L - 1)
    def _():
        logits_ref[...] = (
            jnp.dot(out_ref[...], wfc_ref[...],
                    preferred_element_type=jnp.float32)
            + bfc_ref[...])
    # TODO(synk): a wavefront schedule across layers (layer l at step t-l)
    # and sharding the projection/FC matmuls over a "parallel" row-block grid
    # axis (v7x 2nd TensorCore) would shorten the serial critical path, but
    # both require all layers' weights resident at once, conflicting with the
    # per-layer streaming needed to fit v7x VMEM at hidden=1024.


def _nbytes(shape, dtype):
    n = 1
    for s in shape:
        n *= int(s)
    return n * jnp.dtype(dtype).itemsize


def lstm_fc_forward(x_emb, h0, c0, lstm_params, w_fc, b_fc):
    T, B, D = x_emb.shape
    L, _, H = h0.shape
    V = w_fc.shape[1]
    assert D <= H, "layer-0 input projection is zero-padded from loc_dim to hidden"

    # Pad vocab to a multiple of 128 for lane-dense, unmasked output stores.
    Vp = int(pl.cdiv(V, 128)) * 128
    if Vp != V:
        w_fc = jnp.pad(w_fc, ((0, 0), (0, Vp - V)))
        b_fc = jnp.pad(b_fc, ((0, 0), (0, Vp - V)))

    # Permute gate columns from PyTorch (i,f,g,o) to (i,f,o,g): one sigmoid
    # over a contiguous 3H block + one tanh in the kernel.
    def perm_gates(w):
        return jnp.concatenate(
            [w[..., :2 * H], w[..., 3 * H:], w[..., 2 * H:3 * H]], axis=-1)

    wih_l, whh_l, b_l = [], [], []
    for (w_ih, w_hh, b) in lstm_params:
        w_ih = perm_gates(w_ih)
        if w_ih.shape[0] < H:                       # zero-pad layer-0 rows D->H
            w_ih = jnp.pad(w_ih, ((0, H - w_ih.shape[0]), (0, 0)))
        wih_l.append(w_ih.astype(jnp.bfloat16))
        whh_l.append(perm_gates(w_hh).astype(jnp.bfloat16))
        b_l.append(perm_gates(b).astype(jnp.float32))
    wih = jnp.stack(wih_l)                          # (L, H, 4H) bf16, streamed
    whh = jnp.stack(whh_l)                          # (L, H, 4H) bf16, streamed
    bb = jnp.stack(b_l)                             # (L, 1, 4H) f32, streamed

    x2d = x_emb.reshape(T * B, D).astype(jnp.bfloat16)
    if D < H:
        x2d = jnp.pad(x2d, ((0, 0), (0, H - D)))
    w_fc = w_fc.astype(jnp.bfloat16)
    b_fc = b_fc.astype(jnp.float32)

    # VMEM budget from explicit per-buffer counts: streamed per-layer blocks
    # are double-buffered by the pipeline (x2); grid-invariant blocks counted
    # x2 conservatively; scratch x1.  Clamp to ~90% of physical VMEM.
    streamed = (2 * _nbytes((H, 4 * H), jnp.bfloat16)        # w_ih + w_hh
                + _nbytes((1, 4 * H), jnp.float32)            # b
                + 4 * _nbytes((B, H), jnp.float32))           # h0, c0, hN, cN
    resident = (_nbytes((T * B, H), jnp.bfloat16)             # x
                + _nbytes((H, Vp), jnp.bfloat16)              # w_fc
                + _nbytes((1, Vp), jnp.float32)               # b_fc
                + _nbytes((T * B, Vp), jnp.float32))          # logits
    scratch = (_nbytes((T * B, 4 * H), jnp.bfloat16)
               + _nbytes((T * B, H), jnp.bfloat16))
    vmem_need = 2 * streamed + 2 * resident + scratch
    try:
        vmem_cap = int(pltpu.get_tpu_info().vmem_capacity_bytes)
    except Exception:
        vmem_cap = 128 << 20
    vmem_limit = int(min(max(int(1.25 * vmem_need), 32 << 20),
                         int(0.9 * vmem_cap)))

    kernel = functools.partial(_lstm_fc_kernel, T, B, H, L)
    logits2d, hN, cN = pl.pallas_call(
        kernel,
        grid=(L,),
        out_shape=(jax.ShapeDtypeStruct((T * B, Vp), jnp.float32),
                   jax.ShapeDtypeStruct((L, B, H), jnp.float32),
                   jax.ShapeDtypeStruct((L, B, H), jnp.float32)),
        in_specs=[
            pl.BlockSpec((T * B, H), lambda l: (0, 0)),             # x (bf16)
            pl.BlockSpec((None, B, H), lambda l: (l, 0, 0)),        # h0
            pl.BlockSpec((None, B, H), lambda l: (l, 0, 0)),        # c0
            pl.BlockSpec((None, H, 4 * H), lambda l: (l, 0, 0)),    # w_ih
            pl.BlockSpec((None, H, 4 * H), lambda l: (l, 0, 0)),    # w_hh
            pl.BlockSpec((None, 1, 4 * H), lambda l: (l, 0, 0)),    # b
            pl.BlockSpec((H, Vp), lambda l: (0, 0)),                # w_fc
            pl.BlockSpec((1, Vp), lambda l: (0, 0)),                # b_fc
        ],
        out_specs=(
            pl.BlockSpec((T * B, Vp), lambda l: (0, 0)),            # logits
            pl.BlockSpec((None, B, H), lambda l: (l, 0, 0)),        # hN
            pl.BlockSpec((None, B, H), lambda l: (l, 0, 0)),        # cN
        ),
        scratch_shapes=[pltpu.VMEM((T * B, 4 * H), jnp.bfloat16),   # xproj
                        pltpu.VMEM((T * B, H), jnp.bfloat16)],      # out
        compiler_params=pltpu.CompilerParams(
            dimension_semantics=("arbitrary",),      # layers are sequential
            vmem_limit_bytes=vmem_limit),
    )(x2d, h0, c0, wih, whh, bb, w_fc, b_fc)

    logits = logits2d[:, :V].reshape(T, B, V)
    return logits, (hN, cN)


# ---------------------------------------------------------------------------
# Full module forward: emb -> lstm -> fc   (returns logits, state)
# ---------------------------------------------------------------------------
def forward(loc, prev_state, emb_table, lstm_params, w_fc, b_fc):
    h0, c0 = prev_state
    # Embedding gather (glue / not the hot path): (T, B) -> (T, B, D), bf16
    # table halves gather + input-DMA traffic (x is only ever an MXU operand).
    # torch.squeeze in the original module is a no-op for T>1, B>1; we keep
    # the explicit (T, B, D) layout instead of squeezing blindly.
    x_emb = jnp.take(emb_table.astype(jnp.bfloat16), loc, axis=0)
    return lstm_fc_forward(x_emb, h0, c0, lstm_params, w_fc, b_fc)


# ---------------------------------------------------------------------------
# Pure-JAX f32 reference for validation (PyTorch gate order i,f,g,o).
# ---------------------------------------------------------------------------
def reference(loc, h0, c0, emb_table, lstm_params, w_fc, b_fc):
    x = jnp.take(emb_table, loc, axis=0)
    T = x.shape[0]
    H = h0.shape[-1]
    hs, cs = [], []
    for l, (w_ih, w_hh, b) in enumerate(lstm_params):
        h, c = h0[l], c0[l]
        outs = []
        for t in range(T):
            gates = x[t] @ w_ih + h @ w_hh + b
            i = jax.nn.sigmoid(gates[:, :H])
            f = jax.nn.sigmoid(gates[:, H:2 * H])
            g = jnp.tanh(gates[:, 2 * H:3 * H])
            o = jax.nn.sigmoid(gates[:, 3 * H:])
            c = f * c + i * g
            h = o * jnp.tanh(c)
            outs.append(h)
        x = jnp.stack(outs)
        hs.append(h)
        cs.append(c)
    logits = x @ w_fc + b_fc
    return logits, jnp.stack(hs), jnp.stack(cs)


if __name__ == "__main__":
    n_vocab = 256
    loc_dim = 128     # module uses 256; scaled down
    hidden = 128      # module uses 1024; scaled down
    num_layers = 3
    T, B = 8, 8       # seq length T; B is init_state's "sequence_length" dim

    key = jax.random.PRNGKey(0)
    keys = jax.random.split(key, 16)
    k_scale = 1.0 / float(jnp.sqrt(hidden))

    emb_table = 0.1 * jax.random.normal(keys[0], (n_vocab, loc_dim), jnp.float32)

    lstm_params = []
    ki = 1
    for l in range(num_layers):
        din = loc_dim if l == 0 else hidden
        w_ih = jax.random.uniform(keys[ki], (din, 4 * hidden), jnp.float32,
                                  -k_scale, k_scale); ki += 1
        w_hh = jax.random.uniform(keys[ki], (hidden, 4 * hidden), jnp.float32,
                                  -k_scale, k_scale); ki += 1
        # combined b_ih + b_hh
        b = jax.random.uniform(keys[ki], (1, 4 * hidden), jnp.float32,
                               -k_scale, k_scale); ki += 1
        lstm_params.append((w_ih, w_hh, b))

    w_fc = jax.random.uniform(keys[ki], (hidden, n_vocab), jnp.float32,
                              -k_scale, k_scale); ki += 1
    b_fc = jax.random.uniform(keys[ki], (1, n_vocab), jnp.float32,
                              -k_scale, k_scale); ki += 1

    loc = jax.random.randint(keys[ki], (T, B), 0, n_vocab, jnp.int32); ki += 1
    h0 = jnp.zeros((num_layers, B, hidden), jnp.float32)
    c0 = jnp.zeros((num_layers, B, hidden), jnp.float32)

    logits, (hN, cN) = forward(loc, (h0, c0), emb_table, lstm_params, w_fc, b_fc)
    jax.block_until_ready((logits, hN, cN))

    ref_logits, ref_hN, ref_cN = reference(loc, h0, c0, emb_table,
                                           lstm_params, w_fc, b_fc)
    assert logits.shape == (T, B, n_vocab)
    assert hN.shape == (num_layers, B, hidden) and cN.shape == hN.shape
    # Tolerance accounts for bf16 weights / x / xproj (f32 accumulation).
    assert jnp.max(jnp.abs(logits - ref_logits)) < 2e-2
    assert jnp.max(jnp.abs(hN - ref_hN)) < 2e-2
    assert jnp.max(jnp.abs(cN - ref_cN)) < 2e-2

    print("KERNEL_OK")
</pallas_src>

<mosaic_0001>
module attributes {stable_mosaic.version = 11 : i64} {
  func.func @_lstm_fc_kernel(%arg0: i32, %arg1: memref<64x128xbf16, #tpu.memory_space<vmem>>, %arg2: memref<1x8x128xf32, #tpu.memory_space<vmem>>, %arg3: memref<1x8x128xf32, #tpu.memory_space<vmem>>, %arg4: memref<1x128x512xbf16, #tpu.memory_space<vmem>>, %arg5: memref<1x128x512xbf16, #tpu.memory_space<vmem>>, %arg6: memref<1x1x512xf32, #tpu.memory_space<vmem>>, %arg7: memref<128x256xbf16, #tpu.memory_space<vmem>>, %arg8: memref<1x256xf32, #tpu.memory_space<vmem>>, %arg9: memref<64x256xf32, #tpu.memory_space<vmem>>, %arg10: memref<1x8x128xf32, #tpu.memory_space<vmem>>, %arg11: memref<1x8x128xf32, #tpu.memory_space<vmem>>, %arg12: memref<64x512xbf16, #tpu.memory_space<vmem>>, %arg13: memref<64x128xbf16, #tpu.memory_space<vmem>>) attributes {dimension_semantics = [#tpu.dimension_semantics<arbitrary>], iteration_bounds = array<i64: 3>, scalar_prefetch = 0 : i64, scratch_operands = 2 : i64, tpu.core_type = #tpu.core_type<tc>, window_params = [{pipeline_mode = #tpu.pipeline_mode<synchronous>, transform_indices = @transform_0, window_bounds = array<i64: 64, 128>}, {transform_indices = @transform_1, window_bounds = array<i64: 1, 8, 128>}, {transform_indices = @transform_2, window_bounds = array<i64: 1, 8, 128>}, {transform_indices = @transform_3, window_bounds = array<i64: 1, 128, 512>}, {transform_indices = @transform_4, window_bounds = array<i64: 1, 128, 512>}, {transform_indices = @transform_5, window_bounds = array<i64: 1, 1, 512>}, {pipeline_mode = #tpu.pipeline_mode<synchronous>, transform_indices = @transform_6, window_bounds = array<i64: 128, 256>}, {pipeline_mode = #tpu.pipeline_mode<synchronous>, transform_indices = @transform_7, window_bounds = array<i64: 1, 256>}, {pipeline_mode = #tpu.pipeline_mode<synchronous>, transform_indices = @transform_8, window_bounds = array<i64: 64, 256>}, {transform_indices = @transform_9, window_bounds = array<i64: 1, 8, 128>}, {transform_indices = @transform_10, window_bounds = array<i64: 1, 8, 128>}]} {
    %c0_i32 = arith.constant 0 : i32
    %0 = arith.cmpi eq, %arg0, %c0_i32 : i32
    %1 = arith.extui %0 : i1 to i32
    %c0_i32_0 = arith.constant 0 : i32
    %2 = arith.cmpi ne, %1, %c0_i32_0 : i32
    scf.if %2 {
      %c0_89 = arith.constant 0 : index
      %c0_90 = arith.constant 0 : index
      %266 = vector.load %arg1[%c0_89, %c0_90] : memref<64x128xbf16, #tpu.memory_space<vmem>>, vector<64x128xbf16>
      %c0_91 = arith.constant 0 : index
      %c0_92 = arith.constant 0 : index
      %267 = vector.load %arg13[%c0_91, %c0_92] : memref<64x128xbf16, #tpu.memory_space<vmem>>, vector<64x128xbf16>
      tpu.vector_store %arg13[%c0_91, %c0_92], %266 {strides = array<i32>} : memref<64x128xbf16, #tpu.memory_space<vmem>>, vector<64x128xbf16>,
    } else {
    }
    %c0 = arith.constant 0 : index
    %c0_1 = arith.constant 0 : index
    %3 = vector.load %arg13[%c0, %c0_1] : memref<64x128xbf16, #tpu.memory_space<vmem>>, vector<64x128xbf16>
    %c0_2 = arith.constant 0 : index
    %c0_3 = arith.constant 0 : index
    %c0_4 = arith.constant 0 : index
    %4 = vector.load %arg4[%c0_2, %c0_3, %c0_4] : memref<1x128x512xbf16, #tpu.memory_space<vmem>>, vector<1x128x512xbf16>
    %5 = vector.shape_cast %4 : vector<1x128x512xbf16> to vector<128x512xbf16>
    %cst = arith.constant dense<0.000000e+00> : vector<64x512xf32>
    %6 = tpu.matmul %3, %5, %cst {dimension_numbers = #tpu.dot_dimension_numbers<[1], [0], [0], [1], [0, 0, 1, 1], [], []>} : vector<64x128xbf16>, vector<128x512xbf16>, vector<64x512xf32> -> vector<64x512xf32>
    %7 = arith.truncf %6 : vector<64x512xf32> to vector<64x512xbf16>
    %c0_5 = arith.constant 0 : index
    %c0_6 = arith.constant 0 : index
    %8 = vector.load %arg12[%c0_5, %c0_6] : memref<64x512xbf16, #tpu.memory_space<vmem>>, vector<64x512xbf16>
    tpu.vector_store %arg12[%c0_5, %c0_6], %7 {strides = array<i32>} : memref<64x512xbf16, #tpu.memory_space<vmem>>, vector<64x512xbf16>,
    %c0_7 = arith.constant 0 : index
    %c0_8 = arith.constant 0 : index
    %c0_9 = arith.constant 0 : index
    %9 = vector.load %arg6[%c0_7, %c0_8, %c0_9] : memref<1x1x512xf32, #tpu.memory_space<vmem>>, vector<1x1x512xf32>
    %10 = vector.shape_cast %9 : vector<1x1x512xf32> to vector<1x512xf32>
    %11 = vector.shape_cast %10 : vector<1x512xf32> to vector<1x512xf32>
    %12 = vector.broadcast %11 : vector<1x512xf32> to vector<8x512xf32>
    %c0_10 = arith.constant 0 : index
    %c0_11 = arith.constant 0 : index
    %c0_12 = arith.constant 0 : index
    %13 = vector.load %arg2[%c0_10, %c0_11, %c0_12] : memref<1x8x128xf32, #tpu.memory_space<vmem>>, vector<1x8x128xf32>
    %14 = vector.shape_cast %13 : vector<1x8x128xf32> to vector<8x128xf32>
    %c0_13 = arith.constant 0 : index
    %c0_14 = arith.constant 0 : index
    %c0_15 = arith.constant 0 : index
    %15 = vector.load %arg3[%c0_13, %c0_14, %c0_15] : memref<1x8x128xf32, #tpu.memory_space<vmem>>, vector<1x8x128xf32>
    %16 = vector.shape_cast %15 : vector<1x8x128xf32> to vector<8x128xf32>
    %c0_i32_16 = arith.constant 0 : i32
    %c8_i32 = arith.constant 8 : i32
    %17 = arith.muli %c0_i32_16, %c8_i32 : i32
    %18 = tpu.assume_multiple %17, 8 : i32
    %19 = arith.index_cast %18 : i32 to index
    %c0_17 = arith.constant 0 : index
    %20 = vector.load %arg12[%19, %c0_17] : memref<64x512xbf16, #tpu.memory_space<vmem>>, vector<8x512xbf16>
    %21 = arith.truncf %14 : vector<8x128xf32> to vector<8x128xbf16>
    %c0_18 = arith.constant 0 : index
    %c0_19 = arith.constant 0 : index
    %c0_20 = arith.constant 0 : index
    %22 = vector.load %arg5[%c0_18, %c0_19, %c0_20] : memref<1x128x512xbf16, #tpu.memory_space<vmem>>, vector<1x128x512xbf16>
    %23 = vector.shape_cast %22 : vector<1x128x512xbf16> to vector<128x512xbf16>
    %cst_21 = arith.constant dense<0.000000e+00> : vector<8x512xf32>
    %24 = tpu.matmul %21, %23, %cst_21 {dimension_numbers = #tpu.dot_dimension_numbers<[1], [0], [0], [1], [0, 0, 1, 1], [], []>} : vector<8x128xbf16>, vector<128x512xbf16>, vector<8x512xf32> -> vector<8x512xf32>
    %25 = arith.extf %20 : vector<8x512xbf16> to vector<8x512xf32>
    %26 = arith.addf %25, %24 : vector<8x512xf32>
    %27 = arith.addf %26, %12 : vector<8x512xf32>
    %28 = vector.extract_strided_slice %27 {offsets = [0, 0], sizes = [8, 384], strides = [1, 1]} : vector<8x512xf32> to vector<8x384xf32>
    %29 = arith.negf %28 : vector<8x384xf32>
    %30 = math.exp %29 : vector<8x384xf32>
    %cst_22 = arith.constant 1.000000e+00 : f32
    %31 = vector.broadcast %cst_22 : f32 to vector<8x384xf32>
    %32 = arith.addf %31, %30 : vector<8x384xf32>
    %33 = arith.divf %31, %32 : vector<8x384xf32>
    %34 = vector.extract_strided_slice %33 {offsets = [0, 0], sizes = [8, 128], strides = [1, 1]} : vector<8x384xf32> to vector<8x128xf32>
    %35 = vector.extract_strided_slice %33 {offsets = [0, 128], sizes = [8, 128], strides = [1, 1]} : vector<8x384xf32> to vector<8x128xf32>
    %36 = vector.extract_strided_slice %33 {offsets = [0, 256], sizes = [8, 128], strides = [1, 1]} : vector<8x384xf32> to vector<8x128xf32>
    %37 = vector.extract_strided_slice %27 {offsets = [0, 384], sizes = [8, 128], strides = [1, 1]} : vector<8x512xf32> to vector<8x128xf32>
    %38 = math.tanh %37 : vector<8x128xf32>
    %39 = arith.mulf %35, %16 : vector<8x128xf32>
    %40 = arith.mulf %34, %38 : vector<8x128xf32>
    %41 = arith.addf %39, %40 : vector<8x128xf32>
    %42 = math.tanh %41 : vector<8x128xf32>
    %43 = arith.mulf %36, %42 : vector<8x128xf32>
    %44 = arith.truncf %43 : vector<8x128xf32> to vector<8x128xbf16>
    %45 = arith.index_cast %18 : i32 to index
    %c0_23 = arith.constant 0 : index
    %46 = vector.load %arg13[%45, %c0_23] : memref<64x128xbf16, #tpu.memory_space<vmem>>, vector<8x128xbf16>
    tpu.vector_store %arg13[%45, %c0_23], %44 {strides = array<i32>} : memref<64x128xbf16, #tpu.memory_space<vmem>>, vector<8x128xbf16>,
    %c1_i32 = arith.constant 1 : i32
    %c8_i32_24 = arith.constant 8 : i32
    %47 = arith.muli %c1_i32, %c8_i32_24 : i32
    %48 = tpu.assume_multiple %47, 8 : i32
    %49 = arith.index_cast %48 : i32 to index
    %c0_25 = arith.constant 0 : index
    %50 = vector.load %arg12[%49, %c0_25] : memref<64x512xbf16, #tpu.memory_space<vmem>>, vector<8x512xbf16>
    %51 = arith.truncf %43 : vector<8x128xf32> to vector<8x128xbf16>
    %c0_26 = arith.constant 0 : index
    %c0_27 = arith.constant 0 : index
    %c0_28 = arith.constant 0 : index
    %52 = vector.load %arg5[%c0_26, %c0_27, %c0_28] : memref<1x128x512xbf16, #tpu.memory_space<vmem>>, vector<1x128x512xbf16>
    %53 = vector.shape_cast %52 : vector<1x128x512xbf16> to vector<128x512xbf16>
    %cst_29 = arith.constant dense<0.000000e+00> : vector<8x512xf32>
    %54 = tpu.matmul %51, %53, %cst_29 {dimension_numbers = #tpu.dot_dimension_numbers<[1], [0], [0], [1], [0, 0, 1, 1], [], []>} : vector<8x128xbf16>, vector<128x512xbf16>, vector<8x512xf32> -> vector<8x512xf32>
    %55 = arith.extf %50 : vector<8x512xbf16> to vector<8x512xf32>
    %56 = arith.addf %55, %54 : vector<8x512xf32>
    %57 = arith.addf %56, %12 : vector<8x512xf32>
    %58 = vector.extract_strided_slice %57 {offsets = [0, 0], sizes = [8, 384], strides = [1, 1]} : vector<8x512xf32> to vector<8x384xf32>
    %59 = arith.negf %58 : vector<8x384xf32>
    %60 = math.exp %59 : vector<8x384xf32>
    %cst_30 = arith.constant 1.000000e+00 : f32
    %61 = vector.broadcast %cst_30 : f32 to vector<8x384xf32>
    %62 = arith.addf %61, %60 : vector<8x384xf32>
    %63 = arith.divf %61, %62 : vector<8x384xf32>
    %64 = vector.extract_strided_slice %63 {offsets = [0, 0], sizes = [8, 128], strides = [1, 1]} : vector<8x384xf32> to vector<8x128xf32>
    %65 = vector.extract_strided_slice %63 {offsets = [0, 128], sizes = [8, 128], strides = [1, 1]} : vector<8x384xf32> to vector<8x128xf32>
    %66 = vector.extract_strided_slice %63 {offsets = [0, 256], sizes = [8, 128], strides = [1, 1]} : vector<8x384xf32> to vector<8x128xf32>
    %67 = vector.extract_strided_slice %57 {offsets = [0, 384], sizes = [8, 128], strides = [1, 1]} : vector<8x512xf32> to vector<8x128xf32>
    %68 = math.tanh %67 : vector<8x128xf32>
    %69 = arith.mulf %65, %41 : vector<8x128xf32>
    %70 = arith.mulf %64, %68 : vector<8x128xf32>
    %71 = arith.addf %69, %70 : vector<8x128xf32>
    %72 = math.tanh %71 : vector<8x128xf32>
    %73 = arith.mulf %66, %72 : vector<8x128xf32>
    %74 = arith.truncf %73 : vector<8x128xf32> to vector<8x128xbf16>
    %75 = arith.index_cast %48 : i32 to index
    %c0_31 = arith.constant 0 : index
    %76 = vector.load %arg13[%75, %c0_31] : memref<64x128xbf16, #tpu.memory_space<vmem>>, vector<8x128xbf16>
    tpu.vector_store %arg13[%75, %c0_31], %74 {strides = array<i32>} : memref<64x128xbf16, #tpu.memory_space<vmem>>, vector<8x128xbf16>,
    %c2_i32 = arith.constant 2 : i32
    %c8_i32_32 = arith.constant 8 : i32
    %77 = arith.muli %c2_i32, %c8_i32_32 : i32
    %78 = tpu.assume_multiple %77, 8 : i32
    %79 = arith.index_cast %78 : i32 to index
    %c0_33 = arith.constant 0 : index
    %80 = vector.load %arg12[%79, %c0_33] : memref<64x512xbf16, #tpu.memory_space<vmem>>, vector<8x512xbf16>
    %81 = arith.truncf %73 : vector<8x128xf32> to vector<8x128xbf16>
    %c0_34 = arith.constant 0 : index
    %c0_35 = arith.constant 0 : index
    %c0_36 = arith.constant 0 : index
    %82 = vector.load %arg5[%c0_34, %c0_35, %c0_36] : memref<1x128x512xbf16, #tpu.memory_space<vmem>>, vector<1x128x512xbf16>
    %83 = vector.shape_cast %82 : vector<1x128x512xbf16> to vector<128x512xbf16>
    %cst_37 = arith.constant dense<0.000000e+00> : vector<8x512xf32>
    %84 = tpu.matmul %81, %83, %cst_37 {dimension_numbers = #tpu.dot_dimension_numbers<[1], [0], [0], [1], [0, 0, 1, 1], [], []>} : vector<8x128xbf16>, vector<128x512xbf16>, vector<8x512xf32> -> vector<8x512xf32>
    %85 = arith.extf %80 : vector<8x512xbf16> to vector<8x512xf32>
    %86 = arith.addf %85, %84 : vector<8x512xf32>
    %87 = arith.addf %86, %12 : vector<8x512xf32>
    %88 = vector.extract_strided_slice %87 {offsets = [0, 0], sizes = [8, 384], strides = [1, 1]} : vector<8x512xf32> to vector<8x384xf32>
    %89 = arith.negf %88 : vector<8x384xf32>
    %90 = math.exp %89 : vector<8x384xf32>
    %cst_38 = arith.constant 1.000000e+00 : f32
    %91 = vector.broadcast %cst_38 : f32 to vector<8x384xf32>
    %92 = arith.addf %91, %90 : vector<8x384xf32>
    %93 = arith.divf %91, %92 : vector<8x384xf32>
    %94 = vector.extract_strided_slice %93 {offsets = [0, 0], sizes = [8, 128], strides = [1, 1]} : vector<8x384xf32> to vector<8x128xf32>
    %95 = vector.extract_strided_slice %93 {offsets = [0, 128], sizes = [8, 128], strides = [1, 1]} : vector<8x384xf32> to vector<8x128xf32>
    %96 = vector.extract_strided_slice %93 {offsets = [0, 256], sizes = [8, 128], strides = [1, 1]} : vector<8x384xf32> to vector<8x128xf32>
    %97 = vector.extract_strided_slice %87 {offsets = [0, 384], sizes = [8, 128], strides = [1, 1]} : vector<8x512xf32> to vector<8x128xf32>
    %98 = math.tanh %97 : vector<8x128xf32>
    %99 = arith.mulf %95, %71 : vector<8x128xf32>
    %100 = arith.mulf %94, %98 : vector<8x128xf32>
    %101 = arith.addf %99, %100 : vector<8x128xf32>
    %102 = math.tanh %101 : vector<8x128xf32>
    %103 = arith.mulf %96, %102 : vector<8x128xf32>
    %104 = arith.truncf %103 : vector<8x128xf32> to vector<8x128xbf16>
    %105 = arith.index_cast %78 : i32 to index
    %c0_39 = arith.constant 0 : index
    %106 = vector.load %arg13[%105, %c0_39] : memref<64x128xbf16, #tpu.memory_space<vmem>>, vector<8x128xbf16>
    tpu.vector_store %arg13[%105, %c0_39], %104 {strides = array<i32>} : memref<64x128xbf16, #tpu.memory_space<vmem>>, vector<8x128xbf16>,
    %c3_i32 = arith.constant 3 : i32
    %c8_i32_40 = arith.constant 8 : i32
    %107 = arith.muli %c3_i32, %c8_i32_40 : i32
    %108 = tpu.assume_multiple %107, 8 : i32
    %109 = arith.index_cast %108 : i32 to index
    %c0_41 = arith.constant 0 : index
    %110 = vector.load %arg12[%109, %c0_41] : memref<64x512xbf16, #tpu.memory_space<vmem>>, vector<8x512xbf16>
    %111 = arith.truncf %103 : vector<8x128xf32> to vector<8x128xbf16>
    %c0_42 = arith.constant 0 : index
    %c0_43 = arith.constant 0 : index
    %c0_44 = arith.constant 0 : index
    %112 = vector.load %arg5[%c0_42, %c0_43, %c0_44] : memref<1x128x512xbf16, #tpu.memory_space<vmem>>, vector<1x128x512xbf16>
    %113 = vector.shape_cast %112 : vector<1x128x512xbf16> to vector<128x512xbf16>
    %cst_45 = arith.constant dense<0.000000e+00> : vector<8x512xf32>
    %114 = tpu.matmul %111, %113, %cst_45 {dimension_numbers = #tpu.dot_dimension_numbers<[1], [0], [0], [1], [0, 0, 1, 1], [], []>} : vector<8x128xbf16>, vector<128x512xbf16>, vector<8x512xf32> -> vector<8x512xf32>
    %115 = arith.extf %110 : vector<8x512xbf16> to vector<8x512xf32>
    %116 = arith.addf %115, %114 : vector<8x512xf32>
    %117 = arith.addf %116, %12 : vector<8x512xf32>
    %118 = vector.extract_strided_slice %117 {offsets = [0, 0], sizes = [8, 384], strides = [1, 1]} : vector<8x512xf32> to vector<8x384xf32>
    %119 = arith.negf %118 : vector<8x384xf32>
    %120 = math.exp %119 : vector<8x384xf32>
    %cst_46 = arith.constant 1.000000e+00 : f32
    %121 = vector.broadcast %cst_46 : f32 to vector<8x384xf32>
    %122 = arith.addf %121, %120 : vector<8x384xf32>
    %123 = arith.divf %121, %122 : vector<8x384xf32>
    %124 = vector.extract_strided_slice %123 {offsets = [0, 0], sizes = [8, 128], strides = [1, 1]} : vector<8x384xf32> to vector<8x128xf32>
    %125 = vector.extract_strided_slice %123 {offsets = [0, 128], sizes = [8, 128], strides = [1, 1]} : vector<8x384xf32> to vector<8x128xf32>
    %126 = vector.extract_strided_slice %123 {offsets = [0, 256], sizes = [8, 128], strides = [1, 1]} : vector<8x384xf32> to vector<8x128xf32>
    %127 = vector.extract_strided_slice %117 {offsets = [0, 384], sizes = [8, 128], strides = [1, 1]} : vector<8x512xf32> to vector<8x128xf32>
    %128 = math.tanh %127 : vector<8x128xf32>
    %129 = arith.mulf %125, %101 : vector<8x128xf32>
    %130 = arith.mulf %124, %128 : vector<8x128xf32>
    %131 = arith.addf %129, %130 : vector<8x128xf32>
    %132 = math.tanh %131 : vector<8x128xf32>
    %133 = arith.mulf %126, %132 : vector<8x128xf32>
    %134 = arith.truncf %133 : vector<8x128xf32> to vector<8x128xbf16>
    %135 = arith.index_cast %108 : i32 to index
    %c0_47 = arith.constant 0 : index
    %136 = vector.load %arg13[%135, %c0_47] : memref<64x128xbf16, #tpu.memory_space<vmem>>, vector<8x128xbf16>
    tpu.vector_store %arg13[%135, %c0_47], %134 {strides = array<i32>} : memref<64x128xbf16, #tpu.memory_space<vmem>>, vector<8x128xbf16>,
    %c4_i32 = arith.constant 4 : i32
    %c8_i32_48 = arith.constant 8 : i32
    %137 = arith.muli %c4_i32, %c8_i32_48 : i32
    %138 = tpu.assume_multiple %137, 8 : i32
    %139 = arith.index_cast %138 : i32 to index
    %c0_49 = arith.constant 0 : index
    %140 = vector.load %arg12[%139, %c0_49] : memref<64x512xbf16, #tpu.memory_space<vmem>>, vector<8x512xbf16>
    %141 = arith.truncf %133 : vector<8x128xf32> to vector<8x128xbf16>
    %c0_50 = arith.constant 0 : index
    %c0_51 = arith.constant 0 : index
    %c0_52 = arith.constant 0 : index
    %142 = vector.load %arg5[%c0_50, %c0_51, %c0_52] : memref<1x128x512xbf16, #tpu.memory_space<vmem>>, vector<1x128x512xbf16>
    %143 = vector.shape_cast %142 : vector<1x128x512xbf16> to vector<128x512xbf16>
    %cst_53 = arith.constant dense<0.000000e+00> : vector<8x512xf32>
    %144 = tpu.matmul %141, %143, %cst_53 {dimension_numbers = #tpu.dot_dimension_numbers<[1], [0], [0], [1], [0, 0, 1, 1], [], []>} : vector<8x128xbf16>, vector<128x512xbf16>, vector<8x512xf32> -> vector<8x512xf32>
    %145 = arith.extf %140 : vector<8x512xbf16> to vector<8x512xf32>
    %146 = arith.addf %145, %144 : vector<8x512xf32>
    %147 = arith.addf %146, %12 : vector<8x512xf32>
    %148 = vector.extract_strided_slice %147 {offsets = [0, 0], sizes = [8, 384], strides = [1, 1]} : vector<8x512xf32> to vector<8x384xf32>
    %149 = arith.negf %148 : vector<8x384xf32>
    %150 = math.exp %149 : vector<8x384xf32>
    %cst_54 = arith.constant 1.000000e+00 : f32
    %151 = vector.broadcast %cst_54 : f32 to vector<8x384xf32>
    %152 = arith.addf %151, %150 : vector<8x384xf32>
    %153 = arith.divf %151, %152 : vector<8x384xf32>
    %154 = vector.extract_strided_slice %153 {offsets = [0, 0], sizes = [8, 128], strides = [1, 1]} : vector<8x384xf32> to vector<8x128xf32>
    %155 = vector.extract_strided_slice %153 {offsets = [0, 128], sizes = [8, 128], strides = [1, 1]} : vector<8x384xf32> to vector<8x128xf32>
    %156 = vector.extract_strided_slice %153 {offsets = [0, 256], sizes = [8, 128], strides = [1, 1]} : vector<8x384xf32> to vector<8x128xf32>
    %157 = vector.extract_strided_slice %147 {offsets = [0, 384], sizes = [8, 128], strides = [1, 1]} : vector<8x512xf32> to vector<8x128xf32>
    %158 = math.tanh %157 : vector<8x128xf32>
    %159 = arith.mulf %155, %131 : vector<8x128xf32>
    %160 = arith.mulf %154, %158 : vector<8x128xf32>
    %161 = arith.addf %159, %160 : vector<8x128xf32>
    %162 = math.tanh %161 : vector<8x128xf32>
    %163 = arith.mulf %156, %162 : vector<8x128xf32>
    %164 = arith.truncf %163 : vector<8x128xf32> to vector<8x128xbf16>
    %165 = arith.index_cast %138 : i32 to index
    %c0_55 = arith.constant 0 : index
    %166 = vector.load %arg13[%165, %c0_55] : memref<64x128xbf16, #tpu.memory_space<vmem>>, vector<8x128xbf16>
    tpu.vector_store %arg13[%165, %c0_55], %164 {strides = array<i32>} : memref<64x128xbf16, #tpu.memory_space<vmem>>, vector<8x128xbf16>,
    %c5_i32 = arith.constant 5 : i32
    %c8_i32_56 = arith.constant 8 : i32
    %167 = arith.muli %c5_i32, %c8_i32_56 : i32
    %168 = tpu.assume_multiple %167, 8 : i32
    %169 = arith.index_cast %168 : i32 to index
    %c0_57 = arith.constant 0 : index
    %170 = vector.load %arg12[%169, %c0_57] : memref<64x512xbf16, #tpu.memory_space<vmem>>, vector<8x512xbf16>
    %171 = arith.truncf %163 : vector<8x128xf32> to vector<8x128xbf16>
    %c0_58 = arith.constant 0 : index
    %c0_59 = arith.constant 0 : index
    %c0_60 = arith.constant 0 : index
    %172 = vector.load %arg5[%c0_58, %c0_59, %c0_60] : memref<1x128x512xbf16, #tpu.memory_space<vmem>>, vector<1x128x512xbf16>
    %173 = vector.shape_cast %172 : vector<1x128x512xbf16> to vector<128x512xbf16>
    %cst_61 = arith.constant dense<0.000000e+00> : vector<8x512xf32>
    %174 = tpu.matmul %171, %173, %cst_61 {dimension_numbers = #tpu.dot_dimension_numbers<[1], [0], [0], [1], [0, 0, 1, 1], [], []>} : vector<8x128xbf16>, vector<128x512xbf16>, vector<8x512xf32> -> vector<8x512xf32>
    %175 = arith.extf %170 : vector<8x512xbf16> to vector<8x512xf32>
    %176 = arith.addf %175, %174 : vector<8x512xf32>
    %177 = arith.addf %176, %12 : vector<8x512xf32>
    %178 = vector.extract_strided_slice %177 {offsets = [0, 0], sizes = [8, 384], strides = [1, 1]} : vector<8x512xf32> to vector<8x384xf32>
    %179 = arith.negf %178 : vector<8x384xf32>
    %180 = math.exp %179 : vector<8x384xf32>
    %cst_62 = arith.constant 1.000000e+00 : f32
    %181 = vector.broadcast %cst_62 : f32 to vector<8x384xf32>
    %182 = arith.addf %181, %180 : vector<8x384xf32>
    %183 = arith.divf %181, %182 : vector<8x384xf32>
    %184 = vector.extract_strided_slice %183 {offsets = [0, 0], sizes = [8, 128], strides = [1, 1]} : vector<8x384xf32> to vector<8x128xf32>
    %185 = vector.extract_strided_slice %183 {offsets = [0, 128], sizes = [8, 128], strides = [1, 1]} : vector<8x384xf32> to vector<8x128xf32>
    %186 = vector.extract_strided_slice %183 {offsets = [0, 256], sizes = [8, 128], strides = [1, 1]} : vector<8x384xf32> to vector<8x128xf32>
    %187 = vector.extract_strided_slice %177 {offsets = [0, 384], sizes = [8, 128], strides = [1, 1]} : vector<8x512xf32> to vector<8x128xf32>
    %188 = math.tanh %187 : vector<8x128xf32>
    %189 = arith.mulf %185, %161 : vector<8x128xf32>
    %190 = arith.mulf %184, %188 : vector<8x128xf32>
    %191 = arith.addf %189, %190 : vector<8x128xf32>
    %192 = math.tanh %191 : vector<8x128xf32>
    %193 = arith.mulf %186, %192 : vector<8x128xf32>
    %194 = arith.truncf %193 : vector<8x128xf32> to vector<8x128xbf16>
    %195 = arith.index_cast %168 : i32 to index
    %c0_63 = arith.constant 0 : index
    %196 = vector.load %arg13[%195, %c0_63] : memref<64x128xbf16, #tpu.memory_space<vmem>>, vector<8x128xbf16>
    tpu.vector_store %arg13[%195, %c0_63], %194 {strides = array<i32>} : memref<64x128xbf16, #tpu.memory_space<vmem>>, vector<8x128xbf16>,
    %c6_i32 = arith.constant 6 : i32
    %c8_i32_64 = arith.constant 8 : i32
    %197 = arith.muli %c6_i32, %c8_i32_64 : i32
    %198 = tpu.assume_multiple %197, 8 : i32
    %199 = arith.index_cast %198 : i32 to index
    %c0_65 = arith.constant 0 : index
    %200 = vector.load %arg12[%199, %c0_65] : memref<64x512xbf16, #tpu.memory_space<vmem>>, vector<8x512xbf16>
    %201 = arith.truncf %193 : vector<8x128xf32> to vector<8x128xbf16>
    %c0_66 = arith.constant 0 : index
    %c0_67 = arith.constant 0 : index
    %c0_68 = arith.constant 0 : index
    %202 = vector.load %arg5[%c0_66, %c0_67, %c0_68] : memref<1x128x512xbf16, #tpu.memory_space<vmem>>, vector<1x128x512xbf16>
    %203 = vector.shape_cast %202 : vector<1x128x512xbf16> to vector<128x512xbf16>
    %cst_69 = arith.constant dense<0.000000e+00> : vector<8x512xf32>
    %204 = tpu.matmul %201, %203, %cst_69 {dimension_numbers = #tpu.dot_dimension_numbers<[1], [0], [0], [1], [0, 0, 1, 1], [], []>} : vector<8x128xbf16>, vector<128x512xbf16>, vector<8x512xf32> -> vector<8x512xf32>
    %205 = arith.extf %200 : vector<8x512xbf16> to vector<8x512xf32>
    %206 = arith.addf %205, %204 : vector<8x512xf32>
    %207 = arith.addf %206, %12 : vector<8x512xf32>
    %208 = vector.extract_strided_slice %207 {offsets = [0, 0], sizes = [8, 384], strides = [1, 1]} : vector<8x512xf32> to vector<8x384xf32>
    %209 = arith.negf %208 : vector<8x384xf32>
    %210 = math.exp %209 : vector<8x384xf32>
    %cst_70 = arith.constant 1.000000e+00 : f32
    %211 = vector.broadcast %cst_70 : f32 to vector<8x384xf32>
    %212 = arith.addf %211, %210 : vector<8x384xf32>
    %213 = arith.divf %211, %212 : vector<8x384xf32>
    %214 = vector.extract_strided_slice %213 {offsets = [0, 0], sizes = [8, 128], strides = [1, 1]} : vector<8x384xf32> to vector<8x128xf32>
    %215 = vector.extract_strided_slice %213 {offsets = [0, 128], sizes = [8, 128], strides = [1, 1]} : vector<8x384xf32> to vector<8x128xf32>
    %216 = vector.extract_strided_slice %213 {offsets = [0, 256], sizes = [8, 128], strides = [1, 1]} : vector<8x384xf32> to vector<8x128xf32>
    %217 = vector.extract_strided_slice %207 {offsets = [0, 384], sizes = [8, 128], strides = [1, 1]} : vector<8x512xf32> to vector<8x128xf32>
    %218 = math.tanh %217 : vector<8x128xf32>
    %219 = arith.mulf %215, %191 : vector<8x128xf32>
    %220 = arith.mulf %214, %218 : vector<8x128xf32>
    %221 = arith.addf %219, %220 : vector<8x128xf32>
    %222 = math.tanh %221 : vector<8x128xf32>
    %223 = arith.mulf %216, %222 : vector<8x128xf32>
    %224 = arith.truncf %223 : vector<8x128xf32> to vector<8x128xbf16>
    %225 = arith.index_cast %198 : i32 to index
    %c0_71 = arith.constant 0 : index
    %226 = vector.load %arg13[%225, %c0_71] : memref<64x128xbf16, #tpu.memory_space<vmem>>, vector<8x128xbf16>
    tpu.vector_store %arg13[%225, %c0_71], %224 {strides = array<i32>} : memref<64x128xbf16, #tpu.memory_space<vmem>>, vector<8x128xbf16>,
    %c7_i32 = arith.constant 7 : i32
    %c8_i32_72 = arith.constant 8 : i32
    %227 = arith.muli %c7_i32, %c8_i32_72 : i32
    %228 = tpu.assume_multiple %227, 8 : i32
    %229 = arith.index_cast %228 : i32 to index
    %c0_73 = arith.constant 0 : index
    %230 = vector.load %arg12[%229, %c0_73] : memref<64x512xbf16, #tpu.memory_space<vmem>>, vector<8x512xbf16>
    %231 = arith.truncf %223 : vector<8x128xf32> to vector<8x128xbf16>
    %c0_74 = arith.constant 0 : index
    %c0_75 = arith.constant 0 : index
    %c0_76 = arith.constant 0 : index
    %232 = vector.load %arg5[%c0_74, %c0_75, %c0_76] : memref<1x128x512xbf16, #tpu.memory_space<vmem>>, vector<1x128x512xbf16>
    %233 = vector.shape_cast %232 : vector<1x128x512xbf16> to vector<128x512xbf16>
    %cst_77 = arith.constant dense<0.000000e+00> : vector<8x512xf32>
    %234 = tpu.matmul %231, %233, %cst_77 {dimension_numbers = #tpu.dot_dimension_numbers<[1], [0], [0], [1], [0, 0, 1, 1], [], []>} : vector<8x128xbf16>, vector<128x512xbf16>, vector<8x512xf32> -> vector<8x512xf32>
    %235 = arith.extf %230 : vector<8x512xbf16> to vector<8x512xf32>
    %236 = arith.addf %235, %234 : vector<8x512xf32>
    %237 = arith.addf %236, %12 : vector<8x512xf32>
    %238 = vector.extract_strided_slice %237 {offsets = [0, 0], sizes = [8, 384], strides = [1, 1]} : vector<8x512xf32> to vector<8x384xf32>
    %239 = arith.negf %238 : vector<8x384xf32>
    %240 = math.exp %239 : vector<8x384xf32>
    %cst_78 = arith.constant 1.000000e+00 : f32
    %241 = vector.broadcast %cst_78 : f32 to vector<8x384xf32>
    %242 = arith.addf %241, %240 : vector<8x384xf32>
    %243 = arith.divf %241, %242 : vector<8x384xf32>
    %244 = vector.extract_strided_slice %243 {offsets = [0, 0], sizes = [8, 128], strides = [1, 1]} : vector<8x384xf32> to vector<8x128xf32>
    %245 = vector.extract_strided_slice %243 {offsets = [0, 128], sizes = [8, 128], strides = [1, 1]} : vector<8x384xf32> to vector<8x128xf32>
    %246 = vector.extract_strided_slice %243 {offsets = [0, 256], sizes = [8, 128], strides = [1, 1]} : vector<8x384xf32> to vector<8x128xf32>
    %247 = vector.extract_strided_slice %237 {offsets = [0, 384], sizes = [8, 128], strides = [1, 1]} : vector<8x512xf32> to vector<8x128xf32>
    %248 = math.tanh %247 : vector<8x128xf32>
    %249 = arith.mulf %245, %221 : vector<8x128xf32>
    %250 = arith.mulf %244, %248 : vector<8x128xf32>
    %251 = arith.addf %249, %250 : vector<8x128xf32>
    %252 = math.tanh %251 : vector<8x128xf32>
    %253 = arith.mulf %246, %252 : vector<8x128xf32>
    %254 = arith.truncf %253 : vector<8x128xf32> to vector<8x128xbf16>
    %255 = arith.index_cast %228 : i32 to index
    %c0_79 = arith.constant 0 : index
    %256 = vector.load %arg13[%255, %c0_79] : memref<64x128xbf16, #tpu.memory_space<vmem>>, vector<8x128xbf16>
    tpu.vector_store %arg13[%255, %c0_79], %254 {strides = array<i32>} : memref<64x128xbf16, #tpu.memory_space<vmem>>, vector<8x128xbf16>,
    %c8_i32_80 = arith.constant 8 : i32
    %c0_81 = arith.constant 0 : index
    %c0_82 = arith.constant 0 : index
    %c0_83 = arith.constant 0 : index
    %257 = vector.load %arg10[%c0_81, %c0_82, %c0_83] : memref<1x8x128xf32, #tpu.memory_space<vmem>>, vector<1x8x128xf32>
    %258 = vector.shape_cast %257 : vector<1x8x128xf32> to vector<8x128xf32>
    %259 = vector.shape_cast %253 : vector<8x128xf32> to vector<1x8x128xf32>
    tpu.vector_store %arg10[%c0_81, %c0_82, %c0_83], %259 {strides = array<i32>} : memref<1x8x128xf32, #tpu.memory_space<vmem>>, vector<1x8x128xf32>,
    %c0_84 = arith.constant 0 : index
    %c0_85 = arith.constant 0 : index
    %c0_86 = arith.constant 0 : index
    %260 = vector.load %arg11[%c0_84, %c0_85, %c0_86] : memref<1x8x128xf32, #tpu.memory_space<vmem>>, vector<1x8x128xf32>
    %261 = vector.shape_cast %260 : vector<1x8x128xf32> to vector<8x128xf32>
    %262 = vector.shape_cast %251 : vector<8x128xf32> to vector<1x8x128xf32>
    tpu.vector_store %arg11[%c0_84, %c0_85, %c0_86], %262 {strides = array<i32>} : memref<1x8x128xf32, #tpu.memory_space<vmem>>, vector<1x8x128xf32>,
    %c2_i32_87 = arith.constant 2 : i32
    %263 = arith.cmpi eq, %arg0, %c2_i32_87 : i32
    %264 = arith.extui %263 : i1 to i32
    %c0_i32_88 = arith.constant 0 : i32
    %265 = arith.cmpi ne, %264, %c0_i32_88 : i32
    scf.if %265 {
      %c0_89 = arith.constant 0 : index
      %c0_90 = arith.constant 0 : index
      %266 = vector.load %arg13[%c0_89, %c0_90] : memref<64x128xbf16, #tpu.memory_space<vmem>>, vector<64x128xbf16>
      %c0_91 = arith.constant 0 : index
      %c0_92 = arith.constant 0 : index
      %267 = vector.load %arg7[%c0_91, %c0_92] : memref<128x256xbf16, #tpu.memory_space<vmem>>, vector<128x256xbf16>
      %cst_93 = arith.constant dense<0.000000e+00> : vector<64x256xf32>
      %268 = tpu.matmul %266, %267, %cst_93 {dimension_numbers = #tpu.dot_dimension_numbers<[1], [0], [0], [1], [0, 0, 1, 1], [], []>} : vector<64x128xbf16>, vector<128x256xbf16>, vector<64x256xf32> -> vector<64x256xf32>
      %c0_94 = arith.constant 0 : index
      %c0_95 = arith.constant 0 : index
      %269 = vector.load %arg8[%c0_94, %c0_95] : memref<1x256xf32, #tpu.memory_space<vmem>>, vector<1x256xf32>
      %270 = vector.broadcast %269 : vector<1x256xf32> to vector<64x256xf32>
      %271 = arith.addf %268, %270 : vector<64x256xf32>
      %c0_96 = arith.constant 0 : index
      %c0_97 = arith.constant 0 : index
      %272 = vector.load %arg9[%c0_96, %c0_97] : memref<64x256xf32, #tpu.memory_space<vmem>>, vector<64x256xf32>
      tpu.vector_store %arg9[%c0_96, %c0_97], %271 {strides = array<i32>} : memref<64x256xf32, #tpu.memory_space<vmem>>, vector<64x256xf32>,
    } else {
    }
    return
  }
  func.func @transform_0(%arg0: i32) -> (i32, i32) {
    %c0_i32 = arith.constant 0 : i32
    %c0_i32_0 = arith.constant 0 : i32
    %c0_i32_1 = arith.constant 0 : i32
    return %c0_i32, %c0_i32_0 : i32, i32
  }
  func.func @transform_1(%arg0: i32) -> (i32, i32, i32) {
    %c0_i32 = arith.constant 0 : i32
    %c0_i32_0 = arith.constant 0 : i32
    %c0_i32_1 = arith.constant 0 : i32
    return %arg0, %c0_i32, %c0_i32_0 : i32, i32, i32
  }
  func.func @transform_2(%arg0: i32) -> (i32, i32, i32) {
    %c0_i32 = arith.constant 0 : i32
    %c0_i32_0 = arith.constant 0 : i32
    %c0_i32_1 = arith.constant 0 : i32
    return %arg0, %c0_i32, %c0_i32_0 : i32, i32, i32
  }
  func.func @transform_3(%arg0: i32) -> (i32, i32, i32) {
    %c0_i32 = arith.constant 0 : i32
    %c0_i32_0 = arith.constant 0 : i32
    %c0_i32_1 = arith.constant 0 : i32
    return %arg0, %c0_i32, %c0_i32_0 : i32, i32, i32
  }
  func.func @transform_4(%arg0: i32) -> (i32, i32, i32) {
    %c0_i32 = arith.constant 0 : i32
    %c0_i32_0 = arith.constant 0 : i32
    %c0_i32_1 = arith.constant 0 : i32
    return %arg0, %c0_i32, %c0_i32_0 : i32, i32, i32
  }
  func.func @transform_5(%arg0: i32) -> (i32, i32, i32) {
    %c0_i32 = arith.constant 0 : i32
    %c0_i32_0 = arith.constant 0 : i32
    %c0_i32_1 = arith.constant 0 : i32
    return %arg0, %c0_i32, %c0_i32_0 : i32, i32, i32
  }
  func.func @transform_6(%arg0: i32) -> (i32, i32) {
    %c0_i32 = arith.constant 0 : i32
    %c0_i32_0 = arith.constant 0 : i32
    %c0_i32_1 = arith.constant 0 : i32
    return %c0_i32, %c0_i32_0 : i32, i32
  }
  func.func @transform_7(%arg0: i32) -> (i32, i32) {
    %c0_i32 = arith.constant 0 : i32
    %c0_i32_0 = arith.constant 0 : i32
    %c0_i32_1 = arith.constant 0 : i32
    return %c0_i32, %c0_i32_0 : i32, i32
  }
  func.func @transform_8(%arg0: i32) -> (i32, i32) {
    %c0_i32 = arith.constant 0 : i32
    %c0_i32_0 = arith.constant 0 : i32
    %c0_i32_1 = arith.constant 0 : i32
    return %c0_i32, %c0_i32_0 : i32, i32
  }
  func.func @transform_9(%arg0: i32) -> (i32, i32, i32) {
    %c0_i32 = arith.constant 0 : i32
    %c0_i32_0 = arith.constant 0 : i32
    %c0_i32_1 = arith.constant 0 : i32
    return %arg0, %c0_i32, %c0_i32_0 : i32, i32, i32
  }
  func.func @transform_10(%arg0: i32) -> (i32, i32, i32) {
    %c0_i32 = arith.constant 0 : i32
    %c0_i32_0 = arith.constant 0 : i32
    %c0_i32_1 = arith.constant 0 : i32
    return %arg0, %c0_i32, %c0_i32_0 : i32, i32, i32
  }
}

</mosaic_0001>

<bundles_post_ra>
// kernel: tpu_custom_call.1
= control target key start
LH: loop header
LB: loop body
LE: loop exit
PB: predicated region body
PF: predicated region fallthrough
CT: control target
= control target key end

     0   :  { %s6399_s0 = inlined_call_operand.hbm [shape: bf16[64,128], index: 0, kind: input, shape index: {}]   ;;  %s6400_s1 = inlined_call_operand.hbm [shape: f32[3,8,128], index: 1, kind: input, shape index: {}]   ;;  %s6401_s2 = inlined_call_operand.hbm [shape: f32[3,8,128], index: 2, kind: input, shape index: {}]   ;;  %s6402_s3 = inlined_call_operand.hbm [shape: bf16[3,128,512], index: 3, kind: input, shape index: {}]   ;;  %s6403_s4 = inlined_call_operand.hbm [shape: bf16[3,128,512], index: 4, kind: input, shape index: {}]   ;;  %s6404_s5 = inlined_call_operand.hbm [shape: f32[3,1,512], index: 5, kind: input, shape index: {}]   ;;  %s6405_s6 = inlined_call_operand.hbm [shape: bf16[128,256], index: 6, kind: input, shape index: {}]   ;;  %s6406_s7 = inlined_call_operand.vmem [shape: f32[1,256], index: 7, kind: input, shape index: {}]   ;;  %s6407_s8 = inlined_call_operand.hbm [shape: f32[64,256], index: 8, kind: output, shape index: {0}]   ;;  %s6408_s9 = inlined_call_operand.hbm [shape: f32[3,8,128], index: 9, kind: output, shape index: {1}]   ;;  %s6409_s10 = inlined_call_operand.hbm [shape: f32[3,8,128], index: 10, kind: output, shape index: {2}]  }
   0x1   :  { %6441 = sst [smem:[#allocation39_spill]] %s6400_s1 }
   0x2   :  { %6442 = sst [smem:[#allocation40_spill]] %s6405_s6 }
   0x3   :  { %6443 = sst [smem:[#allocation41_spill]] %s6406_s7 }
   0x4   :  { %6444 = sst [smem:[#allocation42_spill]] %s6407_s8 }
   0x5   :  { %6445 = sst [smem:[#allocation43_spill]] %s6408_s9 }
   0x6   :  { %6446 = sst [smem:[#allocation44_spill]] %s6409_s10 }
   0x7   :  { %16 = vsyncpa [#allocation5], 0 }
   0x8   :  { %17 = vsyncpa [#allocation8], 0 }
   0x9   :  { %19 = vsyncpa [#allocation8 + $0x1], 0 }
   0xa   :  { %20 = vsyncpa [#allocation11], 0 }
   0xb   :  { %22 = vsyncpa [#allocation11 + $0x1], 0 }
   0xc   :  { %23 = vsyncpa [#allocation14], 0 }
   0xd   :  { %25 = vsyncpa [#allocation14 + $0x1], 0 }
   0xe   :  { %26 = vsyncpa [#allocation6], 0 }
   0xf   :  { %27 = vsyncpa [#allocation18], 0 }
  0x10   :  { %29 = vsyncpa [#allocation18 + $0x1], 0  ;;  %s5377_s13 = smov 0   ;;  %s5379_s14 = smov 0  }
  0x11   :  { %s5381_s15 = smov 0   ;;  %s5383_s16 = smov 0  }
  0x12 LB: > { %6447 = sst [smem:[#allocation27_spill]] %s5296_s15  ;;  %s5396_s17 = sadd.s32 4294967295, %s5300_s16   ;;  %s5300_s16 = sphi %s5383_s16, %s6506_s16   ;;  %s5296_s15 = sphi %s5381_s15, %s6508_s15   ;;  %s5292_s14 = sphi %s5379_s14, %s6510_s14   ;;  %s5288_s13 = sphi %s5377_s13, %s6509_s13  }
  0x13   : > { %s6410_s18 = sadd.s32 4294967294, %s5300_s16   ;;  %p76_p0 = scmp.ne.s32.totalorder %s5292_s14, %s5288_s13 }
  0x14   : > { %p6418_p1 = scmp.eq.s32.totalorder %s5396_s17, 0  ;;  %p6417_p2 = scmp.eq.s32.totalorder %s5396_s17, 2 }
  0x15   : > { %p273_p3 = scmp.eq.s32.totalorder %s6410_s18, 2  ;;  %p4137_p5 = scmp.ge.s32.totalorder %s5300_s16, 1 }
  0x16   : > { %p5406_p4 = por %p6418_p1, %p76_p0  ;;  %p306_p7 = scmp.lt.s32.totalorder %s5300_s16, 4 }
  0x17   : > { %p5411_p6 = por %p273_p3, %p76_p0  ;;  %s5302_s22 = smov [#allocation15]  }
  0x18   : > { %s6448_s19 = scalar_select %p5406_p4, 1, 0 }
  0x19   : > { %s6449_s20 = scalar_select %p5411_p6, 1, 0 }
  0x1a   : > { %p5417_p9 = pnand %p4137_p5, %p306_p7  ;;  %s331_s23 = sshll.u32 %s5302_s22, 4  ;;  %s332_s23 = int_to_ptr.vmem [resolvable:$true] %s331_s23 }
  0x1b   : > { %6450 = sst [smem:[#allocation28_spill]] %s6449_s20  ;;  %s5430_s25 = sadd.s32 1, %s5300_s16  }
  0x1c   : > { %s6451_s21 = scalar_select %p5417_p9, 1, 0 }
  0x1d   : > { %p4587_p10 = pneg %p5417_p9  ;;  %6453 = sst [smem:[#allocation29_spill]] %s5430_s25 }
  0x1e   : > { %s63_s26 = sadd.s32 1, %s5296_s15  ;;  %s60_s27 = ssub.s32 %s5300_s16, %s5430_s25 }
  0x1f   : > { %p5425_p11 = pnand %p4587_p10, %p6418_p1  ;;  %s4985_s28 = scalar_lea.vmem %s332_s23, 2048 }
  0x20   : > { %p4986_p13 = scmp.ne.s32.totalorder %s332_s23, %s4985_s28  ;;  %p4993_p5 = scmp.lt.s32.totalorder %s332_s23, %s332_s23 }
  0x21   : > { %s6452_s24 = scalar_select %p5425_p11, 1, 0 }
  0x22   : > { %p6419_p12 = pneg %p5425_p11  ;;  %p4994_p7 = scmp.lt.s32.totalorder %s4985_s28, %s4985_s28 }
  0x24   : > { %p4988_p0 = pnand %p4986_p13, %p6419_p12  ;;  %p4995_p10 = por %p4994_p7, %p4993_p5 }
  0x26   : > { %p4989_p3 = pneg %p4988_p0 }
  0x28   : > { %p4996_p8 = pnand %p4995_p10, %p4989_p3 }
  0x2a   : > { %4999 = shalt.err (!%p4996_p8)
}
  0x2b   : > { %s5303_s29 = smov 128   ;;  %s5304_s30 = smov 8  }
  0x2c   : > { %s6454_s6 = sld [smem:[#allocation40_spill]]  ;;  %p61_p13 = scmp.eq.s32.totalorder %s60_s27, 0 }
  0x2d   : > { %p70_p0 = scmp.ne.s32.totalorder %s5296_s15, %s5292_s14  ;;  %p71_p8 = scmp.eq.s32.totalorder %s5300_s16, 0 }
  0x2e   : > { %p4619_p3 = scmp.lt.s32.totalorder %s5300_s16, 3  ;;  %s5459_s28 = sand.u32 1, %s5300_s16  }
  0x2f   : > { %s5450_s13 = scalar_select %p61_p13, %s5296_s15, %s63_s26  }
  0x30   : > { %p72_p5 = por %p71_p8, %p70_p0  ;;  %p5454_p7 = por %p6417_p2, %p70_p0 }
  0x31   : > { %6455 = sst [smem:[#allocation30_spill]] %s5450_s13  ;;  %s5462_s18 = sand.u32 1, %s5296_s15  }
  0x32   : > { %4593 = dma.hbm_to_vmem [thread:$0]  (!%p5425_p11), %s6454_s6, 2048, %s332_s23, [#allocation14], %s5303_s29, %s5303_s29, %s5304_s30  }
  0x33   : > { %s6456_s22 = scalar_select %p5454_p7, 1, 0 }
  0x34   : > { %s6415_s23 = sshll.u32 %s5462_s18, 3  ;;  %s4142_s27 = sshll.u32 %s5300_s16, 7 }
  0x35   : > { %6457 = sst [smem:[#allocation31_spill]] %s6456_s22  ;;  %s352_s11 = scalar_lea.vmem [#allocation7], %s6415_s23 }
  0x36   : > { %s6458_s1 = sld [smem:[#allocation39_spill]]  ;;  %s359_s12 = sshll.u32 %s352_s11, 4  ;;  %s5473_s12 = int_to_ptr.vmem [resolvable:$true] %s359_s12 }
  0x37   : > { %p5475_p10 = pnand %p4619_p3, %p72_p5  ;;  %s5482_s25 = scalar_lea.hbm %s6401_s2, %s4142_s27 }
  0x39   : > { %p5489_p0 = pneg %p5475_p10 }
  0x3c   : > { %s5469_s26 = scalar_lea.hbm %s6458_s1, %s4142_s27  ;;  %s5005_s10 = scalar_lea.hbm %s6458_s1, 384 }
  0x3d   : > { %s5000_s30 = scalar_lea.hbm %s5469_s26, 128  ;;  %p5006_p5 = scmp.lt.s32.totalorder %s5469_s26, %s6458_s1 }
  0x3e   : > { %p5001_p13 = scmp.ne.s32.totalorder %s5469_s26, %s5000_s30  ;;  %p5007_p2 = scmp.lt.s32.totalorder %s5005_s10, %s5000_s30 }
  0x40   : > { %p5003_p8 = pnand %p5489_p0, %p5001_p13  ;;  %p5008_p1 = por %p5007_p2, %p5006_p5 }
  0x42   : > { %p5004_p3 = pneg %p5003_p8 }
  0x44   : > { %p5009_p12 = pnand %p5008_p1, %p5004_p3 }
  0x46   : > { %5012 = shalt.err (!%p5009_p12)
}
  0x47   : > { %s5013_s27 = scalar_lea.vmem %s5473_s12, 128  ;;  %s5305_s29 = smov [#allocation7]  }
  0x48   : > { %p5014_p6 = scmp.ne.s32.totalorder %s5473_s12, %s5013_s27  ;;  %s5018_s23 = sshll.u32 %s5305_s29, 4  ;;  %s5019_s23 = int_to_ptr.vmem [resolvable:$false] %s5018_s23 }
  0x49   : > { %s5020_s11 = scalar_lea.vmem %s5019_s23, 256  ;;  %p5021_p7 = scmp.lt.s32.totalorder %s5473_s12, %s5019_s23 }
  0x4a   : > { %p5016_p13 = pnand %p5014_p6, %p5489_p0  ;;  %p5022_p4 = scmp.lt.s32.totalorder %s5020_s11, %s5013_s27 }
  0x4c   : > { %p5017_p8 = pneg %p5016_p13  ;;  %p5023_p9 = por %p5022_p4, %p5021_p7 }
  0x4e   : > { %p5024_p11 = pnand %p5023_p9, %p5017_p8 }
  0x50   : > { %5027 = shalt.err (!%p5024_p11)
}
  0x51   : > { %s6461_s10 = scalar_lea.sflag [#allocation8], %s5459_s28  ;;  %s4145_s30 = sshll.u32 %s5462_s18, 8 }
  0x52   : > { %4597 = dma.hbm_to_vmem [thread:$0]  (!%p5475_p10), %s5469_s26, 128, %s5473_s12, %s6461_s10  }
  0x53   : > { %s4526_s29 = sshll.u32 %s5300_s16, 12  ;;  %s409_s15 = scalar_lea.vmem [#allocation12], %s4145_s30 }
  0x54   : > { %s416_s13 = sshll.u32 %s409_s15, 4  ;;  %s5518_s11 = scalar_lea.hbm %s6402_s3, %s4526_s29  ;;  %s5520_s13 = int_to_ptr.vmem [resolvable:$true] %s416_s13 }
  0x55   : > { %s388_s1 = scalar_lea.vmem [#allocation10], %s4145_s30  ;;  %s5527_s12 = scalar_lea.hbm %s6403_s4, %s4526_s29 }
  0x56   : > { %s395_s8 = sshll.u32 %s388_s1, 4  ;;  %s6428_s10 = scalar_lea.sflag [#allocation11], %s5459_s28  ;;  %s5522_s8 = int_to_ptr.vmem [resolvable:$true] %s395_s8 }
  0x57   : > { %s5028_s15 = scalar_lea.hbm %s5518_s11, 4096  ;;  %s5033_s22 = scalar_lea.hbm %s6402_s3, 12288 }
  0x58   : > { %p5029_p1 = scmp.ne.s32.totalorder %s5518_s11, %s5028_s15  ;;  %p5034_p6 = scmp.lt.s32.totalorder %s5518_s11, %s6402_s3 }
  0x59   : > { %p5035_p9 = scmp.lt.s32.totalorder %s5033_s22, %s5028_s15 }
  0x5a   : > { %p5031_p2 = pnand %p5029_p1, %p5489_p0 }
  0x5b   : > { %p5036_p11 = por %p5035_p9, %p5034_p6 }
  0x5c   : > { %p5032_p4 = pneg %p5031_p2 }
  0x5e   : > { %p5037_p12 = pnand %p5036_p11, %p5032_p4 }
  0x60   : > { %5040 = shalt.err (!%p5037_p12)
}
  0x61   : > { %s5041_s1 = scalar_lea.vmem %s5522_s8, 4096  ;;  %s5306_s9 = smov [#allocation10]  }
  0x62   : > { %p5042_p7 = scmp.ne.s32.totalorder %s5522_s8, %s5041_s1  ;;  %s5046_s29 = sshll.u32 %s5306_s9, 4  ;;  %s5047_s29 = int_to_ptr.vmem [resolvable:$false] %s5046_s29 }
  0x63   : > { %s5048_s26 = scalar_lea.vmem %s5047_s29, 8192  ;;  %p5049_p13 = scmp.lt.s32.totalorder %s5522_s8, %s5047_s29 }
  0x64   : > { %p5044_p3 = pnand %p5042_p7, %p5489_p0  ;;  %p5050_p8 = scmp.lt.s32.totalorder %s5048_s26, %s5041_s1 }
  0x66   : > { %p5045_p5 = pneg %p5044_p3  ;;  %p5051_p1 = por %p5050_p8, %p5049_p13 }
  0x68   : > { %p5052_p2 = pnand %p5051_p1, %p5045_p5 }
  0x6a   : > { %5055 = shalt.err (!%p5052_p2)
}
  0x6b   : > { %s6429_s7 = smov 256   ;;  %s5308_s22 = smov 16  }
  0x6c   : > { %4603 = dma.hbm_to_vmem [thread:$0]  (!%p5475_p10), %s5518_s11, 4096, %s5522_s8, %s6428_s10, %s6429_s7, %s6429_s7, %s5308_s22  }
  0x6d   : > { %s5309_s15 = smov [#allocation4]   ;;  %s6462_s27 = sshll.u32 %s5462_s18, 3 }
  0x6e   : > { %s318_s23 = sshll.u32 %s5309_s15, 4  ;;  %s370_s30 = scalar_lea.vmem [#allocation9], %s6462_s27  ;;  %s319_s23 = int_to_ptr.vmem [resolvable:$true] %s318_s23 }
  0x6f   : > { %s377_s1 = sshll.u32 %s370_s30, 4  ;;  %s5067_s9 = scalar_lea.vmem %s319_s23, 512  ;;  %s378_s1 = int_to_ptr.vmem [resolvable:$true] %s377_s1 }
  0x70   : > { %p5068_p4 = scmp.ne.s32.totalorder %s319_s23, %s5067_s9  ;;  %p6463_p6 = scmp.ne.s32.totalorder %s6452_s24, 0 }
  0x71   : > { %p5075_p7 = scmp.lt.s32.totalorder %s319_s23, %s319_s23  ;;  %p5076_p3 = scmp.lt.s32.totalorder %s5067_s9, %s5067_s9 }
  0x72   : > { %p6464_p9 = pneg %p6463_p6 }
  0x73   : > { %p5077_p5 = por %p5076_p3, %p5075_p7 }
  0x74   : > { %p5070_p11 = pnand %p5068_p4, %p6464_p9 }
  0x76   : > { %p5071_p12 = pneg %p5070_p11 }
  0x78   : > { %p5078_p13 = pnand %p5077_p5, %p5071_p12 }
  0x7a   : > { %5081 = shalt.err (!%p5078_p13)
}
  0x7b   : > { %s5310_s29 = smov 64   ;;  %s5311_s8 = smov 4  }
  0x7c   : > { %4590 = dma.hbm_to_vmem [thread:$0]  (!%p6463_p6), %s6399_s0, 512, %s319_s23, [#allocation5], %s5310_s29, %s5310_s29, %s5311_s8  }
  0x7d   : > { %s5082_s15 = scalar_lea.hbm %s5482_s25, 128  ;;  %s5087_s9 = scalar_lea.hbm %s6401_s2, 384 }
  0x7e   : > { %p5083_p8 = scmp.ne.s32.totalorder %s5482_s25, %s5082_s15  ;;  %p5088_p4 = scmp.lt.s32.totalorder %s5482_s25, %s6401_s2 }
  0x7f   : > { %p5089_p9 = scmp.lt.s32.totalorder %s5087_s9, %s5082_s15 }
  0x80   : > { %p5085_p1 = pnand %p5083_p8, %p5489_p0 }
  0x81   : > { %p5090_p11 = por %p5089_p9, %p5088_p4 }
  0x82   : > { %p5086_p2 = pneg %p5085_p1 }
  0x84   : > { %p5091_p12 = pnand %p5090_p11, %p5086_p2 }
  0x86   : > { %5094 = shalt.err (!%p5091_p12)
}
  0x87   : > { %s5095_s24 = scalar_lea.vmem %s378_s1, 128  ;;  %s5312_s23 = smov [#allocation9]  }
  0x88   : > { %p5096_p6 = scmp.ne.s32.totalorder %s378_s1, %s5095_s24  ;;  %s5100_s29 = sshll.u32 %s5312_s23, 4  ;;  %s5101_s29 = int_to_ptr.vmem [resolvable:$false] %s5100_s29 }
  0x89   : > { %s5102_s8 = scalar_lea.vmem %s5101_s29, 256  ;;  %p5103_p5 = scmp.lt.s32.totalorder %s378_s1, %s5101_s29 }
  0x8a   : > { %p5098_p7 = pnand %p5096_p6, %p5489_p0  ;;  %p5104_p13 = scmp.lt.s32.totalorder %s5102_s8, %s5095_s24 }
  0x8c   : > { %p5099_p3 = pneg %p5098_p7  ;;  %p5105_p8 = por %p5104_p13, %p5103_p5 }
  0x8e   : > { %p5106_p1 = pnand %p5105_p8, %p5099_p3 }
  0x90   : > { %5109 = shalt.err (!%p5106_p1)
}
  0x91   : > { %s6465_s10 = scalar_lea.sflag [#allocation8], %s5459_s28  ;;  %s5110_s7 = scalar_lea.hbm %s5527_s12, 4096 }
  0x92   : > { %4600 = dma.hbm_to_vmem [thread:$0]  (!%p5475_p10), %s5482_s25, 128, %s378_s1, %s6465_s10  }
  0x93   : > { %p5111_p2 = scmp.ne.s32.totalorder %s5527_s12, %s5110_s7  ;;  %s5115_s15 = scalar_lea.hbm %s6403_s4, 12288 }
  0x94   : > { %p5116_p11 = scmp.lt.s32.totalorder %s5527_s12, %s6403_s4  ;;  %p5117_p12 = scmp.lt.s32.totalorder %s5115_s15, %s5110_s7 }
  0x95   : > { %p5113_p4 = pnand %p5111_p2, %p5489_p0 }
  0x96   : > { %p5118_p6 = por %p5117_p12, %p5116_p11 }
  0x97   : > { %p5114_p9 = pneg %p5113_p4 }
  0x99   : > { %p5119_p7 = pnand %p5118_p6, %p5114_p9 }
  0x9b   : > { %5122 = shalt.err (!%p5119_p7)
}
  0x9c   : > { %s5123_s25 = scalar_lea.vmem %s5520_s13, 4096  ;;  %s5313_s1 = smov [#allocation12]  }
  0x9d   : > { %p5124_p3 = scmp.ne.s32.totalorder %s5520_s13, %s5123_s25  ;;  %s5128_s9 = sshll.u32 %s5313_s1, 4  ;;  %s5129_s9 = int_to_ptr.vmem [resolvable:$false] %s5128_s9 }
  0x9e   : > { %s5130_s24 = scalar_lea.vmem %s5129_s9, 8192  ;;  %p5131_p8 = scmp.lt.s32.totalorder %s5520_s13, %s5129_s9 }
  0x9f   : > { %p5126_p5 = pnand %p5124_p3, %p5489_p0  ;;  %p5132_p1 = scmp.lt.s32.totalorder %s5130_s24, %s5123_s25 }
  0xa1   : > { %p5127_p13 = pneg %p5126_p5  ;;  %p5133_p2 = por %p5132_p1, %p5131_p8 }
  0xa3   : > { %p5134_p4 = pnand %p5133_p2, %p5127_p13 }
  0xa5   : > { %5137 = shalt.err (!%p5134_p4)
}
  0xa6   : > { %s6466_s23 = smov 256   ;;  %s6467_s29 = scalar_lea.sflag [#allocation11], %s5459_s28 }
  0xa7   : > { %4606 = dma.hbm_to_vmem [thread:$0]  (!%p5475_p10), %s5527_s12, 4096, %s5520_s13, %s6467_s29, %s6466_s23, %s6466_s23, %s5308_s22  }
  0xa8   : > { %s4151_s8 = sshll.u32 %s5462_s18, 2  ;;  %s4528_s10 = sshll.u32 %s5300_s16, 6 }
  0xa9   : > { %s5613_s26 = scalar_lea.hbm %s6404_s5, %s4528_s10  ;;  %s430_s15 = scalar_lea.vmem [#allocation13], %s4151_s8 }
  0xaa   : > { %s438_s27 = sshll.u32 %s430_s15, 4  ;;  %s427_s30 = scalar_lea.sflag [#allocation14], %s5459_s28  ;;  %s439_s27 = int_to_ptr.vmem [resolvable:$true] %s438_s27 }
  0xab   : > { %s5138_s25 = scalar_lea.hbm %s5613_s26, 64  ;;  %s5143_s12 = scalar_lea.hbm %s6404_s5, 192 }
  0xac   : > { %p5139_p9 = scmp.ne.s32.totalorder %s5613_s26, %s5138_s25  ;;  %p5144_p6 = scmp.lt.s32.totalorder %s5613_s26, %s6404_s5 }
  0xad   : > { %p5145_p7 = scmp.lt.s32.totalorder %s5143_s12, %s5138_s25 }
  0xae   : > { %p5141_p11 = pnand %p5139_p9, %p5489_p0 }
  0xaf   : > { %p5146_p3 = por %p5145_p7, %p5144_p6 }
  0xb0   : > { %p5142_p12 = pneg %p5141_p11 }
  0xb2   : > { %p5147_p5 = pnand %p5146_p3, %p5142_p12 }
  0xb4   : > { %5150 = shalt.err (!%p5147_p5)
}
  0xb5   : > { %s5151_s9 = scalar_lea.vmem %s439_s27, 64  ;;  %s5314_s28 = smov [#allocation13]  }
  0xb6   : > { %p5152_p13 = scmp.ne.s32.totalorder %s439_s27, %s5151_s9  ;;  %s5156_s24 = sshll.u32 %s5314_s28, 4  ;;  %s5157_s24 = int_to_ptr.vmem [resolvable:$false] %s5156_s24 }
  0xb7   : > { %s5158_s23 = scalar_lea.vmem %s5157_s24, 128  ;;  %p5159_p2 = scmp.lt.s32.totalorder %s439_s27, %s5157_s24 }
  0xb8   : > { %p5154_p8 = pnand %p5152_p13, %p5489_p0  ;;  %p5160_p4 = scmp.lt.s32.totalorder %s5158_s23, %s5151_s9 }
  0xba   : > { %p5155_p1 = pneg %p5154_p8  ;;  %p5161_p9 = por %p5160_p4, %p5159_p2 }
  0xbc   : > { %p5162_p11 = pnand %p5161_p9, %p5155_p1 }
  0xbe   : > { %5165 = shalt.err (!%p5162_p11)
}
  0xbf   : > { %4609 = dma.hbm_to_vmem [thread:$0]  (!%p5475_p10), %s5613_s26, 64, %s439_s27, %s427_s30  }
  0xc0   : > { %p6468_p12 = scmp.ne.s32.totalorder %s6451_s21, 0 }
  0xc2   : > { %447 = sbr.rel (%p6468_p12) target bundleno = 2630 (0xa46), region = 52 }
  0xc7   : > { %p6469_p6 = scmp.eq.s32.totalorder %s5396_s17, 0 }
  0xc9   : > { %5259 = dma.done.wait (%p6469_p6), [#allocation5], 512   ;;  %p6470_p0 = pmov %p6469_p6 }
  0xca   : > { %s5639_s20 = sand.u32 1, %s5396_s17   ;;  %s455_s29 = sand.u32 1, %s5292_s14  }
  0xcb   : > { %5261 = vsyncadd (%p6470_p0), [#allocation5], 4294966784  ;;  %s5642_s8 = sshll.u32 %s455_s29, 3  ;;  %s454_s6 = scalar_lea.sflag [#allocation8], %s5639_s20 }
  0xcc   : > { %s457_s10 = scalar_lea.vmem [#allocation7], %s5642_s8  ;;  %p6471_p10 = scmp.ne.s32.totalorder %s6448_s19, 0 }
  0xce   : > { %5263 = dma.done.wait (%p6471_p10), %s454_s6, 256  }
  0xcf   : > { %5265 = vsyncadd (%p6471_p10), %s454_s6, 4294967040  ;;  %s4158_s21 = sshll.u32 %s455_s29, 8  ;;  %s466_s7 = scalar_lea.vmem [#allocation9], %s5642_s8 }
  0xd0   : > { %s472_s11 = scalar_lea.sflag [#allocation11], %s5639_s20  ;;  %s5652_s26 = scalar_lea.vmem [#allocation10], %s4158_s21 }
  0xd1   : > { %5267 = dma.done.wait (%p6471_p10), %s472_s11, 8192  }
  0xd2   : > { %5269 = vsyncadd (%p6471_p10), %s472_s11, 4294959104  ;;  %s4160_s15 = sshll.u32 %s455_s29, 2  ;;  %s5658_s27 = scalar_lea.vmem [#allocation12], %s4158_s21 }
  0xd3   : > { %s490_s30 = scalar_lea.sflag [#allocation14], %s5639_s20  ;;  %s5661_s25 = scalar_lea.vmem [#allocation13], %s4160_s15 }
  0xd4   : > { %5271 = dma.done.wait (%p6471_p10), %s490_s30, 64  }
  0xd5   : > { %5273 = vsyncadd (%p6471_p10), %s490_s30, 4294967232  ;;  %p6472_p7 = pmov %p6470_p0 }
  0xd6   : > { %p6473_p3 = pmov %p6470_p0 }
  0xd7   : > { %5275 = dma.done.wait (%p6472_p7), [#allocation14], 2048  }
  0xd8   : > { %5277 = vsyncadd (%p6473_p3), [#allocation14], 4294965248  ;;  %s551_s13 = scalar_lea.vmem [#allocation17], %s5642_s8  ;;  %s558_s18 = scalar_lea.vmem [#allocation19], %s5642_s8 }
  0xd9   : > { %p6474_p5 = scmp.ne.s32.totalorder %s5396_s17, 0 }
  0xdb   : > { %563 = sbr.rel (%p6474_p5) target bundleno = 227 (0xe3), region = 84 }
  0xe0   : > { %v564_v0 = vld [vmem:[#allocation4] sm:$0xff]   ;;  %v566_v1 = vld [vmem:[#allocation4 + $0x8] sm:$0xff]   ;;  %v568_v2 = vld [vmem:[#allocation4 + $0x10] sm:$0xff]  }
  0xe1   : > { %572 = vst [vmem:[#allocation3] sm:$0xff] %v564_v0   ;;  %574 = vst [vmem:[#allocation3 + $0x8] sm:$0xff] %v566_v1   ;;  %v570_v3 = vld [vmem:[#allocation4 + $0x18] sm:$0xff]  }
  0xe2   : > { %576 = vst [vmem:[#allocation3 + $0x10] sm:$0xff] %v568_v2   ;;  %578 = vst [vmem:[#allocation3 + $0x18] sm:$0xff] %v570_v3  }
  0xe3 PF: > { %v4670_v4 = vld [vmem:[%s5652_s26 + $0xe4] ss:$16 sps:$4 sm:$0xff]   ;;  %v4672_v5 = vld [vmem:[%s5652_s26 + $0xec] ss:$16 sps:$4 sm:$0xff]   ;;  %v6430_v6 = vmov 0   ;;  %p4497_p13 = scmp.ne.s32.totalorder %s5396_s17, 2 }
  0xe4   : > { %836 = vmatprep.mubr.bf16.mxu0 %v6430_v6  ;;  %909 = vmatprep.mubr.bf16.mxu1 %v6430_v6  ;;  %v4674_v7 = vld [vmem:[%s5652_s26 + $0xe0] ss:$16 sps:$4 sm:$0xff]   ;;  %v4675_v8 = vld [vmem:[%s5652_s26 + $0xe8] ss:$16 sps:$4 sm:$0xff]   ;;  %v4676_v9 = vld [vmem:[%s5652_s26 + $0xc4] ss:$16 sps:$4 sm:$0xff]  }
  0xe5   : > { %804 = vmatprep.subr.bf16.mxu0 %v4670_v4  ;;  %877 = vmatprep.subr.bf16.mxu1 %v4672_v5  ;;  %v4678_v10 = vld [vmem:[%s5652_s26 + $0xcc] ss:$16 sps:$4 sm:$0xff]   ;;  %v4680_v11 = vld [vmem:[%s5652_s26 + $0xc0] ss:$16 sps:$4 sm:$0xff]   ;;  %v4681_v12 = vld [vmem:[%s5652_s26 + $0xc8] ss:$16 sps:$4 sm:$0xff]  }
  0xe6   : > { %805 = vmatpush1.bf16.msra.mxu0 %v4674_v7  ;;  %878 = vmatpush1.bf16.msra.mxu1 %v4675_v8  ;;  %v4682_v13 = vld [vmem:[%s5652_s26 + $0xa4] ss:$16 sps:$4 sm:$0xff]   ;;  %v4684_v14 = vld [vmem:[%s5652_s26 + $0xac] ss:$16 sps:$4 sm:$0xff]   ;;  %v4686_v15 = vld [vmem:[%s5652_s26 + $0xa0] ss:$16 sps:$4 sm:$0xff]  }
  0xe7   : > { %806 = vmatprep.subr.bf16.mxu0 %v4676_v9  ;;  %879 = vmatprep.subr.bf16.mxu1 %v4678_v10  ;;  %v4687_v16 = vld [vmem:[%s5652_s26 + $0xa8] ss:$16 sps:$4 sm:$0xff]   ;;  %v4688_v17 = vld [vmem:[%s5652_s26 + $0x84] ss:$16 sps:$4 sm:$0xff]   ;;  %v4690_v18 = vld [vmem:[%s5652_s26 + $0x8c] ss:$16 sps:$4 sm:$0xff]  }
  0xe8   : > { %v4692_v19 = vld [vmem:[%s5652_s26 + $0x80] ss:$16 sps:$4 sm:$0xff]   ;;  %v4693_v20 = vld [vmem:[%s5652_s26 + $0x88] ss:$16 sps:$4 sm:$0xff]   ;;  %v4694_v21 = vld [vmem:[%s5652_s26 + $0x64] ss:$16 sps:$4 sm:$0xff]  }
  0xe9   : > { %v4696_v22 = vld [vmem:[%s5652_s26 + $0x6c] ss:$16 sps:$4 sm:$0xff]   ;;  %v4698_v23 = vld [vmem:[%s5652_s26 + $0x60] ss:$16 sps:$4 sm:$0xff]   ;;  %v4699_v24 = vld [vmem:[%s5652_s26 + $0x68] ss:$16 sps:$4 sm:$0xff]  }
  0xea   : > { %807 = vmatpush1.bf16.msra.mxu0 %v4680_v11  ;;  %880 = vmatpush1.bf16.msra.mxu1 %v4681_v12  ;;  %v4700_v25 = vld [vmem:[%s5652_s26 + $0x44] ss:$16 sps:$4 sm:$0xff]   ;;  %v4702_v26 = vld [vmem:[%s5652_s26 + $0x4c] ss:$16 sps:$4 sm:$0xff]   ;;  %v4704_v27 = vld [vmem:[%s5652_s26 + $0x40] ss:$16 sps:$4 sm:$0xff]  }
  0xeb   : > { %808 = vmatprep.subr.bf16.mxu0 %v4682_v13  ;;  %881 = vmatprep.subr.bf16.mxu1 %v4684_v14  ;;  %v4705_v28 = vld [vmem:[%s5652_s26 + $0x48] ss:$16 sps:$4 sm:$0xff]   ;;  %v4706_v29 = vld [vmem:[%s5652_s26 + $0x24] ss:$16 sps:$4 sm:$0xff]   ;;  %v4708_v30 = vld [vmem:[%s5652_s26 + $0x2c] ss:$16 sps:$4 sm:$0xff]  }
  0xec   : > { %v4710_v31 = vld [vmem:[%s5652_s26 + $0x20] ss:$16 sps:$4 sm:$0xff]   ;;  %v4711_v32 = vld [vmem:[%s5652_s26 + $0x28] ss:$16 sps:$4 sm:$0xff]   ;;  %v4712_v33 = vld [vmem:[%s5652_s26 + $0x4] ss:$16 sps:$4 sm:$0xff]  }
  0xed   : > { %v4714_v34 = vld [vmem:[%s5652_s26 + $0xc] ss:$16 sps:$4 sm:$0xff]   ;;  %v4716_v35 = vld [vmem:[%s5652_s26] ss:$16 sps:$4 sm:$0xff]   ;;  %v4717_v36 = vld [vmem:[%s5652_s26 + $0x8] ss:$16 sps:$4 sm:$0xff]  }
  0xee   : > { %809 = vmatpush1.bf16.msra.mxu0 %v4686_v15  ;;  %882 = vmatpush1.bf16.msra.mxu1 %v4687_v16  ;;  %v5710_v37 = vld [vmem:[%s5658_s27 + $0xe4] ss:$16 sps:$4 sm:$0xff]   ;;  %v5713_v38 = vld [vmem:[%s5658_s27 + $0xec] ss:$16 sps:$4 sm:$0xff]   ;;  %v5716_v40 = vld [vmem:[%s5658_s27 + $0xe0] ss:$16 sps:$4 sm:$0xff]  }
  0xef   : > { %810 = vmatprep.subr.bf16.mxu0 %v4688_v17  ;;  %883 = vmatprep.subr.bf16.mxu1 %v4690_v18  ;;  %v4718_v39 = vld [vmem:[#allocation3] sm:$0xff]   ;;  %v5719_v41 = vld [vmem:[%s5658_s27 + $0xe8] ss:$16 sps:$4 sm:$0xff]   ;;  %v5727_v43 = vld [vmem:[%s5658_s27 + $0xcc] ss:$16 sps:$4 sm:$0xff]   ;;  %s6490_s22 = sld [smem:[#allocation41_spill]] (!%p4497_p13) }
  0xf0   : > { %v5724_v42 = vld [vmem:[%s5658_s27 + $0xc4] ss:$16 sps:$4 sm:$0xff]   ;;  %v5730_v44 = vld [vmem:[%s5658_s27 + $0xc0] ss:$16 sps:$4 sm:$0xff]   ;;  %v5735_v45 = vld [vmem:[%s5658_s27 + $0xc8] ss:$16 sps:$4 sm:$0xff]  }
  0xf1   : > { %v5740_v46 = vld [vmem:[%s5658_s27 + $0xa4] ss:$16 sps:$4 sm:$0xff]   ;;  %v5743_v47 = vld [vmem:[%s5658_s27 + $0xac] ss:$16 sps:$4 sm:$0xff]   ;;  %v5748_v49 = vld [vmem:[%s5658_s27 + $0xa0] ss:$16 sps:$4 sm:$0xff]  }
  0xf2   : > { %811 = vmatpush1.bf16.msra.mxu0 %v4692_v19  ;;  %884 = vmatpush1.bf16.msra.mxu1 %v4693_v20  ;;  %v4731_v48 = vld [vmem:[#allocation3 + $0x8] sm:$0xff]   ;;  %v5756_v51 = vld [vmem:[%s5658_s27 + $0x84] ss:$16 sps:$4 sm:$0xff]   ;;  %v5764_v53 = vld [vmem:[%s5658_s27 + $0x80] ss:$16 sps:$4 sm:$0xff]  }
  0xf3   : > { %812 = vmatprep.subr.bf16.mxu0 %v4694_v21  ;;  %885 = vmatprep.subr.bf16.mxu1 %v4696_v22  ;;  %v5751_v50 = vld [vmem:[%s5658_s27 + $0xa8] ss:$16 sps:$4 sm:$0xff]   ;;  %v5761_v52 = vld [vmem:[%s5658_s27 + $0x8c] ss:$16 sps:$4 sm:$0xff]   ;;  %v5772_v55 = vld [vmem:[%s5658_s27 + $0x64] ss:$16 sps:$4 sm:$0xff]  }
  0xf4   : > { %v5767_v54 = vld [vmem:[%s5658_s27 + $0x88] ss:$16 sps:$4 sm:$0xff]   ;;  %v5777_v56 = vld [vmem:[%s5658_s27 + $0x6c] ss:$16 sps:$4 sm:$0xff]   ;;  %v4744_v57 = vld [vmem:[#allocation3 + $0x10] sm:$0xff]  }
  0xf5   : > { %v5782_v58 = vld [vmem:[%s5658_s27 + $0x60] ss:$16 sps:$4 sm:$0xff]   ;;  %v5785_v59 = vld [vmem:[%s5658_s27 + $0x68] ss:$16 sps:$4 sm:$0xff]   ;;  %v5788_v60 = vld [vmem:[%s5658_s27 + $0x44] ss:$16 sps:$4 sm:$0xff]  }
  0xf6   : > { %813 = vmatpush1.bf16.msra.mxu0 %v4698_v23  ;;  %886 = vmatpush1.bf16.msra.mxu1 %v4699_v24  ;;  %v5791_v61 = vld [vmem:[%s5658_s27 + $0x4c] ss:$16 sps:$4 sm:$0xff]   ;;  %v5798_v62 = vld [vmem:[%s5658_s27 + $0x40] ss:$16 sps:$4 sm:$0xff]   ;;  %v5801_v63 = vld [vmem:[%s5658_s27 + $0x48] ss:$16 sps:$4 sm:$0xff]  }
  0xf7   : > { %814 = vmatprep.subr.bf16.mxu0 %v4700_v25  ;;  %887 = vmatprep.subr.bf16.mxu1 %v4702_v26  ;;  %v5804_v0 = vld [vmem:[%s5658_s27 + $0x24] ss:$16 sps:$4 sm:$0xff]   ;;  %v5807_v1 = vld [vmem:[%s5658_s27 + $0x2c] ss:$16 sps:$4 sm:$0xff]   ;;  %v5816_v3 = vld [vmem:[%s5658_s27 + $0x20] ss:$16 sps:$4 sm:$0xff]  }
  0xf8   : > { %v4757_v2 = vld [vmem:[#allocation3 + $0x18] sm:$0xff]   ;;  %v5822_v5 = vld [vmem:[%s5658_s27 + $0x4] ss:$16 sps:$4 sm:$0xff]   ;;  %v5834_v8 = vld [vmem:[%s5658_s27] ss:$16 sps:$4 sm:$0xff]  }
  0xf9   : > { %v5819_v4 = vld [vmem:[%s5658_s27 + $0x28] ss:$16 sps:$4 sm:$0xff]   ;;  %v5829_v7 = vld [vmem:[%s5658_s27 + $0xc] ss:$16 sps:$4 sm:$0xff]  }
  0xfa   : > { %815 = vmatpush1.bf16.msra.mxu0 %v4704_v27  ;;  %888 = vmatpush1.bf16.msra.mxu1 %v4705_v28  ;;  %v5837_v9 = vld [vmem:[%s5658_s27 + $0x8] ss:$16 sps:$4 sm:$0xff]  }
  0xfb   : > { %816 = vmatprep.subr.bf16.mxu0 %v4706_v29  ;;  %889 = vmatprep.subr.bf16.mxu1 %v4708_v30  ;;  %v1084_v10 = vld [vmem:[%s457_s10] sm:$0xff] }
  0xfc   : > { %v1091_v11 = vpack.c.bf16 %v1084_v10, %v1084_v10 }
  0xfe   : > { %817 = vmatpush1.bf16.msra.mxu0 %v4710_v31  ;;  %890 = vmatpush1.bf16.msra.mxu1 %v4711_v32 }
  0xff   : > { %818 = vmatprep.subr.bf16.mxu0 %v4712_v33  ;;  %891 = vmatprep.subr.bf16.mxu1 %v4714_v34 }
 0x102   : > { %819 = vmatpush1.bf16.msra.mxu0 %v4716_v35  ;;  %892 = vmatpush1.bf16.msra.mxu1 %v4717_v36 }
 0x103   : > { %1284 = vmatprep.subr.bf16.mxu0 %v5710_v37  ;;  %1325 = vmatprep.subr.bf16.mxu1 %v5713_v38 }
 0x105   : > { %837 = vmatmul.mubr.bf16.vlgmr.msra.gmra.mxu0 %v4718_v39  ;;  %910 = vmatmul.mubr.bf16.vlgmr.msra.gmra.mxu1 %v4718_v39 }
 0x106   : > { %1285 = vmatpush1.bf16.msra.mxu0 %v5716_v40  ;;  %1326 = vmatpush1.bf16.msra.mxu1 %v5719_v41 }
 0x107   : > { %1286 = vmatprep.subr.bf16.mxu0 %v5724_v42  ;;  %1327 = vmatprep.subr.bf16.mxu1 %v5727_v43 }
 0x108   : > { %846 = vmatprep.mubr.bf16.mxu0 %v6430_v6  ;;  %919 = vmatprep.mubr.bf16.mxu1 %v6430_v6 }
 0x10a   : > { %1287 = vmatpush1.bf16.msra.mxu0 %v5730_v44  ;;  %1328 = vmatpush1.bf16.msra.mxu1 %v5735_v45 }
 0x10b   : > { %1288 = vmatprep.subr.bf16.mxu0 %v5740_v46  ;;  %1329 = vmatprep.subr.bf16.mxu1 %v5743_v47 }
 0x10d   : > { %847 = vmatmul.mubr.bf16.gmra.mxu0 %v4731_v48  ;;  %920 = vmatmul.mubr.bf16.gmra.mxu1 %v4731_v48 }
 0x10e   : > { %1289 = vmatpush1.bf16.msra.mxu0 %v5748_v49  ;;  %1330 = vmatpush1.bf16.msra.mxu1 %v5751_v50 }
 0x10f   : > { %1290 = vmatprep.subr.bf16.mxu0 %v5756_v51  ;;  %1331 = vmatprep.subr.bf16.mxu1 %v5761_v52 }
 0x110   : > { %856 = vmatprep.mubr.bf16.mxu0 %v6430_v6  ;;  %929 = vmatprep.mubr.bf16.mxu1 %v6430_v6 }
 0x112   : > { %1291 = vmatpush1.bf16.msra.mxu0 %v5764_v53  ;;  %1332 = vmatpush1.bf16.msra.mxu1 %v5767_v54 }
 0x113   : > { %1292 = vmatprep.subr.bf16.mxu0 %v5772_v55  ;;  %1333 = vmatprep.subr.bf16.mxu1 %v5777_v56 }
 0x115   : > { %857 = vmatmul.mubr.bf16.gmra.mxu0 %v4744_v57  ;;  %930 = vmatmul.mubr.bf16.gmra.mxu1 %v4744_v57 }
 0x116   : > { %1293 = vmatpush1.bf16.msra.mxu0 %v5782_v58  ;;  %1334 = vmatpush1.bf16.msra.mxu1 %v5785_v59 }
 0x117   : > { %1294 = vmatprep.subr.bf16.mxu0 %v5788_v60  ;;  %1335 = vmatprep.subr.bf16.mxu1 %v5791_v61 }
 0x118   : > { %866 = vmatprep.mubr.bf16.mxu0 %v6430_v6  ;;  %939 = vmatprep.mubr.bf16.mxu1 %v6430_v6 }
 0x11a   : > { %1295 = vmatpush1.bf16.msra.mxu0 %v5798_v62  ;;  %1336 = vmatpush1.bf16.msra.mxu1 %v5801_v63 }
 0x11b   : > { %1296 = vmatprep.subr.bf16.mxu0 %v5804_v0  ;;  %1337 = vmatprep.subr.bf16.mxu1 %v5807_v1 }
 0x11d   : > { %867 = vmatmul.mubr.bf16.gmra.mxu0 %v4757_v2  ;;  %940 = vmatmul.mubr.bf16.gmra.mxu1 %v4757_v2  ;;  %v1064_v2 = vlaneseq }
 0x11e   : > { %1297 = vmatpush1.bf16.msra.mxu0 %v5816_v3  ;;  %1338 = vmatpush1.bf16.msra.mxu1 %v5819_v4 }
 0x11f   : > { %1298 = vmatprep.subr.bf16.mxu0 %v5822_v5  ;;  %1339 = vmatprep.subr.bf16.mxu1 %v5829_v7 }
 0x120   : > { %1316 = vmatprep.mubr.bf16.mxu0 %v6430_v6  ;;  %1357 = vmatprep.mubr.bf16.mxu1 %v6430_v6 }
 0x122   : > { %1299 = vmatpush1.bf16.msra.mxu0 %v5834_v8  ;;  %1340 = vmatpush1.bf16.msra.mxu1 %v5837_v9 }
 0x123   : > { %1601 = vmatprep.subr.bf16.mxu0 %v5710_v37  ;;  %1642 = vmatprep.subr.bf16.mxu1 %v5713_v38 }
 0x125   : > { %1317 = vmatmul.mubr.bf16.vlgmr.msra.gmra.mxu0 %v1091_v11  ;;  %1358 = vmatmul.mubr.bf16.vlgmr.msra.gmra.mxu1 %v1091_v11 }
 0x126   : > { %1602 = vmatpush1.bf16.msra.mxu0 %v5716_v40  ;;  %1643 = vmatpush1.bf16.msra.mxu1 %v5719_v41 }
 0x127   : > { %1603 = vmatprep.subr.bf16.mxu0 %v5724_v42  ;;  %1644 = vmatprep.subr.bf16.mxu1 %v5727_v43 }
 0x128   : > { %1633 = vmatprep.mubr.bf16.mxu0 %v6430_v6  ;;  %1674 = vmatprep.mubr.bf16.mxu1 %v6430_v6 }
 0x12a   : > { %1604 = vmatpush1.bf16.msra.mxu0 %v5730_v44  ;;  %1645 = vmatpush1.bf16.msra.mxu1 %v5735_v45 }
 0x12b   : > { %1605 = vmatprep.subr.bf16.mxu0 %v5740_v46  ;;  %1646 = vmatprep.subr.bf16.mxu1 %v5743_v47 }
 0x12e   : > { %1606 = vmatpush1.bf16.msra.mxu0 %v5748_v49  ;;  %1647 = vmatpush1.bf16.msra.mxu1 %v5751_v50 }
 0x12f   : > { %1607 = vmatprep.subr.bf16.mxu0 %v5756_v51  ;;  %1648 = vmatprep.subr.bf16.mxu1 %v5761_v52 }
 0x132   : > { %1608 = vmatpush1.bf16.msra.mxu0 %v5764_v53  ;;  %1649 = vmatpush1.bf16.msra.mxu1 %v5767_v54 }
 0x133   : > { %1609 = vmatprep.subr.bf16.mxu0 %v5772_v55  ;;  %1650 = vmatprep.subr.bf16.mxu1 %v5777_v56 }
 0x136   : > { %1610 = vmatpush1.bf16.msra.mxu0 %v5782_v58  ;;  %1651 = vmatpush1.bf16.msra.mxu1 %v5785_v59 }
 0x137   : > { %1611 = vmatprep.subr.bf16.mxu0 %v5788_v60  ;;  %1652 = vmatprep.subr.bf16.mxu1 %v5791_v61 }
 0x13a   : > { %1612 = vmatpush1.bf16.msra.mxu0 %v5798_v62  ;;  %1653 = vmatpush1.bf16.msra.mxu1 %v5801_v63 }
 0x13b   : > { %1613 = vmatprep.subr.bf16.mxu0 %v5804_v0  ;;  %1654 = vmatprep.subr.bf16.mxu1 %v5807_v1 }
 0x13e   : > { %1614 = vmatpush1.bf16.msra.mxu0 %v5816_v3  ;;  %1655 = vmatpush1.bf16.msra.mxu1 %v5819_v4 }
 0x13f   : > { %1615 = vmatprep.subr.bf16.mxu0 %v5822_v5  ;;  %1656 = vmatprep.subr.bf16.mxu1 %v5829_v7 }
 0x142   : > { %1616 = vmatpush1.bf16.msra.mxu0 %v5834_v8  ;;  %1657 = vmatpush1.bf16.msra.mxu1 %v5837_v9 }
 0x143   : > { %1919 = vmatprep.subr.bf16.mxu0 %v5710_v37  ;;  %1960 = vmatprep.subr.bf16.mxu1 %v5713_v38 }
 0x1c5   : > { %v838_v12 = vpop.f32.mrf.mxu0  ;;  %v911_v13 = vpop.f32.mrf.mxu1 }
 0x1c7   : > { %v840_v14 = vpop.f32.mrf.mxu0  ;;  %v913_v15 = vpop.f32.mrf.mxu1 }
 0x1c9   : > { %v842_v16 = vpop.f32.mrf.mxu0  ;;  %v915_v17 = vpop.f32.mrf.mxu1 }
 0x1cb   : > { %v844_v18 = vpop.f32.mrf.mxu0  ;;  %v917_v19 = vpop.f32.mrf.mxu1 }
 0x1cc   : > { %v5883_v20 = vpack.c.bf16 %v844_v18, %v842_v16  ;;  %v5885_v21 = vpack.c.bf16 %v917_v19, %v915_v17 }
 0x1cd   : > { %v848_v22 = vpop.f32.mrf.mxu0  ;;  %v921_v23 = vpop.f32.mrf.mxu1 }
 0x1cf   : > { %v850_v24 = vpop.f32.mrf.mxu0  ;;  %v923_v25 = vpop.f32.mrf.mxu1 }
 0x1d0   : > { %v5887_v26 = vpack.c.bf16 %v850_v24, %v848_v22  ;;  %v5889_v27 = vpack.c.bf16 %v923_v25, %v921_v23  ;;  %v5903_v22 = vshrl.u32 %v1064_v2, 7 }
 0x1d1   : > { %v852_v28 = vpop.f32.mrf.mxu0  ;;  %v925_v29 = vpop.f32.mrf.mxu1 }
 0x1d3   : > { %v854_v30 = vpop.f32.mrf.mxu0  ;;  %v927_v31 = vpop.f32.mrf.mxu1 }
 0x1d4   : > { %v5891_v32 = vpack.c.bf16 %v854_v30, %v852_v28  ;;  %v5893_v33 = vpack.c.bf16 %v927_v31, %v925_v29  ;;  %v4529_v29 = vpack.c.bf16 %v840_v14, %v838_v12 }
 0x1d5   : > { %v858_v34 = vpop.f32.mrf.mxu0  ;;  %v931_v35 = vpop.f32.mrf.mxu1 }
 0x1d6   : > { %v1366_v14 = vunpack.c.l.bf16 %v4529_v29  ;;  %v1367_v6 = vunpack.c.h.bf16 %v4529_v29 }
 0x1d7   : > { %v860_v36 = vpop.f32.mrf.mxu0  ;;  %v933_v39 = vpop.f32.mrf.mxu1 }
 0x1d8   : > { %v5895_v48 = vpack.c.bf16 %v860_v36, %v858_v34  ;;  %v5897_v57 = vpack.c.bf16 %v933_v39, %v931_v35  ;;  %v6436_v34 = vsub.s32 0, %v5903_v22  ;;  %v1062_v39 = vld [vmem:[%s5661_s25] sm:$0xf] }
 0x1d9   : > { %v862_v10 = vpop.f32.mrf.mxu0  ;;  %v935_v11 = vpop.f32.mrf.mxu1 }
 0x1da   : > { %6475 = vst [vmem:[#allocation32_spill] sm:$0xff] %v5897_v57  ;;  %v5918_v12 = vrot.slane %v1062_v39, %v6436_v34 }
 0x1db   : > { %v864_v16 = vpop.f32.mrf.mxu0  ;;  %v937_v17 = vpop.f32.mrf.mxu1 }
 0x1dc   : > { %v5899_v18 = vpack.c.bf16 %v864_v16, %v862_v10  ;;  %v5901_v19 = vpack.c.bf16 %v937_v17, %v935_v11  ;;  %v6439_v10 = vsub.s32 1, %v5903_v22 }
 0x1dd   : > { %v868_v23 = vpop.f32.mrf.mxu0  ;;  %v941_v24 = vpop.f32.mrf.mxu1 }
 0x1de   : > { %6476 = vst [vmem:[#allocation33_spill] sm:$0xff] %v5899_v18  ;;  %6477 = vst [vmem:[#allocation34_spill] sm:$0xff] %v5901_v19  ;;  %v1074_v19 = vsub.s32 2, %v5903_v22 }
 0x1df   : > { %v870_v25 = vpop.f32.mrf.mxu0  ;;  %v943_v28 = vpop.f32.mrf.mxu1 }
 0x1e0   : > { %v5905_v30 = vpack.c.bf16 %v870_v25, %v868_v23  ;;  %v5907_v31 = vpack.c.bf16 %v943_v28, %v941_v24  ;;  %v5922_v28 = vrot.slane %v1062_v39, %v6439_v10  ;;  %v5927_v29 = vrot.slane %v1062_v39, %v1074_v19 }
 0x1e1   : > { %v872_v35 = vpop.f32.mrf.mxu0  ;;  %v945_v36 = vpop.f32.mrf.mxu1 }
 0x1e2   : > { %6478 = vst [vmem:[#allocation35_spill] sm:$0xff] %v5905_v30  ;;  %6479 = vst [vmem:[#allocation36_spill] sm:$0xff] %v5907_v31 }
 0x1e3   : > { %v874_v11 = vpop.f32.mrf.mxu0  ;;  %v947_v16 = vpop.f32.mrf.mxu1 }
 0x1e4   : > { %v5912_v2 = vpack.c.bf16 %v874_v11, %v872_v35  ;;  %v5914_v17 = vpack.c.bf16 %v947_v16, %v945_v36  ;;  %v4530_v36 = vpack.c.bf16 %v913_v15, %v911_v13 }
 0x1e5   : > { %v1318_v23 = vpop.f32.mrf.mxu0  ;;  %v1359_v24 = vpop.f32.mrf.mxu1 }
 0x1e6   : > { %6480 = vst [vmem:[#allocation37_spill] sm:$0xff] %v5912_v2  ;;  %6481 = vst [vmem:[#allocation38_spill] sm:$0xff] %v5914_v17  ;;  %v1370_v25 = vadd.f32 %v1366_v14, %v1318_v23  ;;  %v1368_v10 = vunpack.c.l.bf16 %v4530_v36  ;;  %v1369_v13 = vunpack.c.h.bf16 %v4530_v36 }
 0x1e7   : > { %v1320_v31 = vpop.f32.mrf.mxu0  ;;  %v1361_v30 = vpop.f32.mrf.mxu1 }
 0x1e8   : > { %v1374_v35 = vadd.f32 %v1370_v25, %v5918_v12  ;;  %v1371_v11 = vadd.f32 %v1367_v6, %v1320_v31  ;;  %v1372_v57 = vadd.f32 %v1368_v10, %v1359_v24  ;;  %v1078_v25 = vsub.s32 3, %v5903_v22 }
 0x1e9   : > { %v1322_v16 = vpop.f32.mrf.mxu0  ;;  %v1363_v17 = vpop.f32.mrf.mxu1  ;;  %v1373_v31 = vadd.f32 %v1369_v13, %v1361_v30 }
 0x1ea   : > { %v4249_v2 = vmul.f32 -1.442695, %v1374_v35  ;;  %v1375_v34 = vadd.f32 %v1371_v11, %v5922_v28  ;;  %v1376_v6 = vadd.f32 %v1372_v57, %v5927_v29  ;;  %v5931_v15 = vrot.slane %v1062_v39, %v1078_v25  ;;  %v1085_v57 = vld [vmem:[%s466_s7] sm:$0xff] }
 0x1eb   : > { %v1323_v18 = vpop.f32.mrf.mxu0  ;;  %v1364_v14 = vpop.f32.mrf.mxu1 }
 0x1ec   : > { %4818 = vpow2.f32 %v4249_v2  ;;  %v4250_v23 = vmul.f32 -1.442695, %v1375_v34  ;;  %v4251_v17 = vmul.f32 -1.442695, %v1376_v6  ;;  %v1377_v18 = vadd.f32 %v1373_v31, %v5931_v15 }
 0x1ed   : > { %v6482_v31 = vmov 0  }
 0x1ee   : > { %4820 = vpow2.f32 %v4250_v23 }
 0x1ef   : > { %4822 = vpow2.f32 %v4251_v17  ;;  %v1683_v17 = vunpack.c.l.bf16 %v5883_v20 }
 0x1f9   : > { %v4819_v35 = vpop.eup %4818 }
 0x1fa   : > { %v1387_v2 = vadd.f32 1.0, %v4819_v35 }
 0x1fb   : > { %v4821_v34 = vpop.eup %4820 }
 0x1fc   : > { %4824 = vrcp.f32 %v1387_v2  ;;  %v1388_v19 = vadd.f32 1.0, %v4821_v34  ;;  %v4823_v10 = vpop.eup %4822  ;;  %v1684_v34 = vunpack.c.h.bf16 %v5883_v20  ;;  %v1686_v20 = vunpack.c.h.bf16 %v5885_v21 }
 0x1fd   : > { %4826 = vtanh.f32 %v1377_v18  ;;  %v1389_v39 = vadd.f32 1.0, %v4823_v10 }
 0x1fe   : > { %4828 = vrcp.f32 %v1388_v19 }
 0x1ff   : > { %4830 = vrcp.f32 %v1389_v39 }
 0x209   : > { %v4825_v24 = vpop.eup %4824 }
 0x20a   : > { %v4827_v11 = vpop.eup %4826 }
 0x20b   : > { %v4829_v36 = vpop.eup %4828  ;;  %v1398_v30 = vmul.f32 %v4827_v11, %v4825_v24 }
 0x20c   : > { %v1397_v16 = vmul.f32 %v4829_v36, %v1085_v57  ;;  %v4831_v23 = vpop.eup %4830 }
 0x20e   : > { %v5936_v14 = vadd.f32 %v1398_v30, %v1397_v16 }
 0x210   : > { %4832 = vtanh.f32 %v5936_v14 }
 0x21d   : > { %v4833_v25 = vpop.eup %4832 }
 0x21e   : > { %v1401_v6 = vmul.f32 %v4833_v25, %v4831_v23 }
 0x220   : > { %v1402_v13 = vpack.c.bf16 %v1401_v6, %v1401_v6 }
 0x222   : > { %1403 = vst [vmem:[#allocation3] sm:$0xf] %v1402_v13  ;;  %1634 = vmatmul.mubr.bf16.vlgmr.msra.gmra.mxu0 %v1402_v13  ;;  %1675 = vmatmul.mubr.bf16.vlgmr.msra.gmra.mxu1 %v1402_v13 }
 0x223   : > { %1920 = vmatpush1.bf16.msra.mxu0 %v5716_v40  ;;  %1961 = vmatpush1.bf16.msra.mxu1 %v5719_v41 }
 0x224   : > { %1921 = vmatprep.subr.bf16.mxu0 %v5724_v42  ;;  %1962 = vmatprep.subr.bf16.mxu1 %v5727_v43 }
 0x225   : > { %1951 = vmatprep.mubr.bf16.mxu0 %v6482_v31  ;;  %1992 = vmatprep.mubr.bf16.mxu1 %v6482_v31 }
 0x227   : > { %1922 = vmatpush1.bf16.msra.mxu0 %v5730_v44  ;;  %1963 = vmatpush1.bf16.msra.mxu1 %v5735_v45 }
 0x228   : > { %1923 = vmatprep.subr.bf16.mxu0 %v5740_v46  ;;  %1964 = vmatprep.subr.bf16.mxu1 %v5743_v47 }
 0x22b   : > { %1924 = vmatpush1.bf16.msra.mxu0 %v5748_v49  ;;  %1965 = vmatpush1.bf16.msra.mxu1 %v5751_v50 }
 0x22c   : > { %1925 = vmatprep.subr.bf16.mxu0 %v5756_v51  ;;  %1966 = vmatprep.subr.bf16.mxu1 %v5761_v52 }
 0x22f   : > { %1926 = vmatpush1.bf16.msra.mxu0 %v5764_v53  ;;  %1967 = vmatpush1.bf16.msra.mxu1 %v5767_v54 }
 0x230   : > { %1927 = vmatprep.subr.bf16.mxu0 %v5772_v55  ;;  %1968 = vmatprep.subr.bf16.mxu1 %v5777_v56 }
 0x233   : > { %1928 = vmatpush1.bf16.msra.mxu0 %v5782_v58  ;;  %1969 = vmatpush1.bf16.msra.mxu1 %v5785_v59 }
 0x234   : > { %1929 = vmatprep.subr.bf16.mxu0 %v5788_v60  ;;  %1970 = vmatprep.subr.bf16.mxu1 %v5791_v61 }
 0x237   : > { %1930 = vmatpush1.bf16.msra.mxu0 %v5798_v62  ;;  %1971 = vmatpush1.bf16.msra.mxu1 %v5801_v63 }
 0x238   : > { %1931 = vmatprep.subr.bf16.mxu0 %v5804_v0  ;;  %1972 = vmatprep.subr.bf16.mxu1 %v5807_v1 }
 0x23b   : > { %1932 = vmatpush1.bf16.msra.mxu0 %v5816_v3  ;;  %1973 = vmatpush1.bf16.msra.mxu1 %v5819_v4 }
 0x23c   : > { %1933 = vmatprep.subr.bf16.mxu0 %v5822_v5  ;;  %1974 = vmatprep.subr.bf16.mxu1 %v5829_v7 }
 0x23f   : > { %1934 = vmatpush1.bf16.msra.mxu0 %v5834_v8  ;;  %1975 = vmatpush1.bf16.msra.mxu1 %v5837_v9 }
 0x240   : > { %2237 = vmatprep.subr.bf16.mxu0 %v5710_v37  ;;  %2278 = vmatprep.subr.bf16.mxu1 %v5713_v38  ;;  %v1685_v38 = vunpack.c.l.bf16 %v5885_v21 }
 0x2e2   : > { %v1635_v35 = vpop.f32.mrf.mxu0  ;;  %v1676_v18 = vpop.f32.mrf.mxu1 }
 0x2e3   : > { %v1687_v2 = vadd.f32 %v1683_v17, %v1635_v35  ;;  %v1689_v25 = vadd.f32 %v1685_v38, %v1676_v18 }
 0x2e4   : > { %v1637_v19 = vpop.f32.mrf.mxu0  ;;  %v1678_v10 = vpop.f32.mrf.mxu1 }
 0x2e5   : > { %v1691_v24 = vadd.f32 %v1687_v2, %v5918_v12  ;;  %v1688_v57 = vadd.f32 %v1684_v34, %v1637_v19  ;;  %v1693_v6 = vadd.f32 %v1689_v25, %v5927_v29  ;;  %v1690_v13 = vadd.f32 %v1686_v20, %v1678_v10 }
 0x2e6   : > { %v1639_v11 = vpop.f32.mrf.mxu0  ;;  %v1680_v36 = vpop.f32.mrf.mxu1 }
 0x2e7   : > { %v4284_v39 = vmul.f32 -1.442695, %v1691_v24  ;;  %v1692_v16 = vadd.f32 %v1688_v57, %v5922_v28  ;;  %v4286_v17 = vmul.f32 -1.442695, %v1693_v6  ;;  %v1694_v35 = vadd.f32 %v1690_v13, %v5931_v15 }
 0x2e8   : > { %v1640_v37 = vpop.f32.mrf.mxu0  ;;  %v1681_v30 = vpop.f32.mrf.mxu1 }
 0x2e9   : > { %4834 = vpow2.f32 %v4284_v39  ;;  %v4285_v23 = vmul.f32 -1.442695, %v1692_v16 }
 0x2eb   : > { %4836 = vpow2.f32 %v4285_v23 }
 0x2ec   : > { %4838 = vpow2.f32 %v4286_v17 }
 0x2ed   : > { %4840 = vtanh.f32 %v1694_v35 }
 0x2f6   : > { %v4835_v2 = vpop.eup %4834 }
 0x2f7   : > { %v1704_v34 = vadd.f32 1.0, %v4835_v2  ;;  %v6032_v2 = vld [vmem:[%s5658_s27 + $0xe4] ss:$16 sps:$4 sm:$0xff]  }
 0x2f8   : > { %v4837_v19 = vpop.eup %4836 }
 0x2f9   : > { %4842 = vrcp.f32 %v1704_v34  ;;  %v1705_v24 = vadd.f32 1.0, %v4837_v19  ;;  %v4839_v57 = vpop.eup %4838  ;;  %v6035_v34 = vld [vmem:[%s5658_s27 + $0xec] ss:$16 sps:$4 sm:$0xff]   ;;  %v6038_v19 = vld [vmem:[%s5658_s27 + $0xe0] ss:$16 sps:$4 sm:$0xff]  }
 0x2fa   : > { %v4841_v11 = vpop.eup %4840  ;;  %v1706_v21 = vadd.f32 1.0, %v4839_v57  ;;  %v6048_v57 = vld [vmem:[%s5658_s27 + $0xc4] ss:$16 sps:$4 sm:$0xff]  }
 0x2fb   : > { %4844 = vrcp.f32 %v1705_v24  ;;  %v6041_v24 = vld [vmem:[%s5658_s27 + $0xe8] ss:$16 sps:$4 sm:$0xff]  }
 0x2fc   : > { %4846 = vrcp.f32 %v1706_v21  ;;  %v6067_v21 = vld [vmem:[%s5658_s27 + $0xac] ss:$16 sps:$4 sm:$0xff]  }
 0x306   : > { %v4843_v18 = vpop.eup %4842 }
 0x307   : > { %v1715_v36 = vmul.f32 %v4843_v18, %v4841_v11  ;;  %v6051_v11 = vld [vmem:[%s5658_s27 + $0xcc] ss:$16 sps:$4 sm:$0xff]   ;;  %v6054_v18 = vld [vmem:[%s5658_s27 + $0xc0] ss:$16 sps:$4 sm:$0xff]  }
 0x308   : > { %v4845_v39 = vpop.eup %4844 }
 0x309   : > { %v1714_v16 = vmul.f32 %v4845_v39, %v5936_v14  ;;  %v4847_v37 = vpop.eup %4846  ;;  %v6064_v39 = vld [vmem:[%s5658_s27 + $0xa4] ss:$16 sps:$4 sm:$0xff]  }
 0x30b   : > { %v5982_v10 = vadd.f32 %v1715_v36, %v1714_v16  ;;  %v6057_v36 = vld [vmem:[%s5658_s27 + $0xc8] ss:$16 sps:$4 sm:$0xff]   ;;  %v6070_v16 = vld [vmem:[%s5658_s27 + $0xa0] ss:$16 sps:$4 sm:$0xff]  }
 0x30d   : > { %4848 = vtanh.f32 %v5982_v10 }
 0x31a   : > { %v4849_v30 = vpop.eup %4848 }
 0x31b   : > { %v1718_v38 = vmul.f32 %v4849_v30, %v4847_v37  ;;  %v6080_v37 = vld [vmem:[%s5658_s27 + $0x84] ss:$16 sps:$4 sm:$0xff]   ;;  %v6083_v30 = vld [vmem:[%s5658_s27 + $0x8c] ss:$16 sps:$4 sm:$0xff]  }
 0x31d   : > { %v1719_v23 = vpack.c.bf16 %v1718_v38, %v1718_v38  ;;  %v6086_v38 = vld [vmem:[%s5658_s27 + $0x80] ss:$16 sps:$4 sm:$0xff]  }
 0x31f   : > { %1721 = vst [vmem:[#allocation3 + $0x4] sm:$0xf] %v1719_v23  ;;  %1952 = vmatmul.mubr.bf16.vlgmr.msra.gmra.mxu0 %v1719_v23  ;;  %1993 = vmatmul.mubr.bf16.vlgmr.msra.gmra.mxu1 %v1719_v23  ;;  %v6089_v23 = vld [vmem:[%s5658_s27 + $0x88] ss:$16 sps:$4 sm:$0xff]  }
 0x320   : > { %2238 = vmatpush1.bf16.msra.mxu0 %v5716_v40  ;;  %2279 = vmatpush1.bf16.msra.mxu1 %v5719_v41  ;;  %v2001_v40 = vunpack.c.l.bf16 %v5887_v26 }
 0x321   : > { %2239 = vmatprep.subr.bf16.mxu0 %v5724_v42  ;;  %2280 = vmatprep.subr.bf16.mxu1 %v5727_v43 }
 0x322   : > { %2269 = vmatprep.mubr.bf16.mxu0 %v6482_v31  ;;  %2310 = vmatprep.mubr.bf16.mxu1 %v6482_v31 }
 0x324   : > { %2240 = vmatpush1.bf16.msra.mxu0 %v5730_v44  ;;  %2281 = vmatpush1.bf16.msra.mxu1 %v5735_v45  ;;  %v2002_v44 = vunpack.c.h.bf16 %v5887_v26 }
 0x325   : > { %2241 = vmatprep.subr.bf16.mxu0 %v5740_v46  ;;  %2282 = vmatprep.subr.bf16.mxu1 %v5743_v47 }
 0x328   : > { %2242 = vmatpush1.bf16.msra.mxu0 %v5748_v49  ;;  %2283 = vmatpush1.bf16.msra.mxu1 %v5751_v50 }
 0x329   : > { %2243 = vmatprep.subr.bf16.mxu0 %v5756_v51  ;;  %2284 = vmatprep.subr.bf16.mxu1 %v5761_v52 }
 0x32c   : > { %2244 = vmatpush1.bf16.msra.mxu0 %v5764_v53  ;;  %2285 = vmatpush1.bf16.msra.mxu1 %v5767_v54 }
 0x32d   : > { %2245 = vmatprep.subr.bf16.mxu0 %v5772_v55  ;;  %2286 = vmatprep.subr.bf16.mxu1 %v5777_v56  ;;  %v2003_v56 = vunpack.c.l.bf16 %v5889_v27 }
 0x330   : > { %2246 = vmatpush1.bf16.msra.mxu0 %v5782_v58  ;;  %2287 = vmatpush1.bf16.msra.mxu1 %v5785_v59 }
 0x331   : > { %2247 = vmatprep.subr.bf16.mxu0 %v5788_v60  ;;  %2288 = vmatprep.subr.bf16.mxu1 %v5791_v61  ;;  %v2004_v60 = vunpack.c.h.bf16 %v5889_v27 }
 0x334   : > { %2248 = vmatpush1.bf16.msra.mxu0 %v5798_v62  ;;  %2289 = vmatpush1.bf16.msra.mxu1 %v5801_v63 }
 0x335   : > { %2249 = vmatprep.subr.bf16.mxu0 %v5804_v0  ;;  %2290 = vmatprep.subr.bf16.mxu1 %v5807_v1 }
 0x338   : > { %2250 = vmatpush1.bf16.msra.mxu0 %v5816_v3  ;;  %2291 = vmatpush1.bf16.msra.mxu1 %v5819_v4 }
 0x339   : > { %2251 = vmatprep.subr.bf16.mxu0 %v5822_v5  ;;  %2292 = vmatprep.subr.bf16.mxu1 %v5829_v7 }
 0x33c   : > { %2252 = vmatpush1.bf16.msra.mxu0 %v5834_v8  ;;  %2293 = vmatpush1.bf16.msra.mxu1 %v5837_v9 }
 0x33d   : > { %2555 = vmatprep.subr.bf16.mxu0 %v6032_v2  ;;  %2596 = vmatprep.subr.bf16.mxu1 %v6035_v34 }
 0x3df   : > { %v1953_v41 = vpop.f32.mrf.mxu0  ;;  %v1994_v42 = vpop.f32.mrf.mxu1 }
 0x3e0   : > { %v2005_v43 = vadd.f32 %v2001_v40, %v1953_v41  ;;  %v2007_v59 = vadd.f32 %v2003_v56, %v1994_v42  ;;  %v6094_v40 = vld [vmem:[%s5658_s27 + $0x64] ss:$16 sps:$4 sm:$0xff]   ;;  %v6097_v41 = vld [vmem:[%s5658_s27 + $0x6c] ss:$16 sps:$4 sm:$0xff]   ;;  %v6102_v42 = vld [vmem:[%s5658_s27 + $0x60] ss:$16 sps:$4 sm:$0xff]  }
 0x3e1   : > { %v1955_v45 = vpop.f32.mrf.mxu0  ;;  %v1996_v46 = vpop.f32.mrf.mxu1  ;;  %v6153_v56 = vld [vmem:[%s5658_s27 + $0x8] ss:$16 sps:$4 sm:$0xff]  }
 0x3e2   : > { %v2009_v47 = vadd.f32 %v2005_v43, %v5918_v12  ;;  %v2006_v49 = vadd.f32 %v2002_v44, %v1955_v45  ;;  %v2011_v61 = vadd.f32 %v2007_v59, %v5927_v29  ;;  %v2008_v62 = vadd.f32 %v2004_v60, %v1996_v46  ;;  %v6105_v43 = vld [vmem:[%s5658_s27 + $0x68] ss:$16 sps:$4 sm:$0xff]   ;;  %v6110_v44 = vld [vmem:[%s5658_s27 + $0x44] ss:$16 sps:$4 sm:$0xff]   ;;  %v6113_v45 = vld [vmem:[%s5658_s27 + $0x4c] ss:$16 sps:$4 sm:$0xff]  }
 0x3e3   : > { %v1957_v50 = vpop.f32.mrf.mxu0  ;;  %v1998_v51 = vpop.f32.mrf.mxu1  ;;  %v6118_v46 = vld [vmem:[%s5658_s27 + $0x40] ss:$16 sps:$4 sm:$0xff]  }
 0x3e4   : > { %v4319_v52 = vmul.f32 -1.442695, %v2009_v47  ;;  %v2010_v53 = vadd.f32 %v2006_v49, %v5922_v28  ;;  %v4321_v63 = vmul.f32 -1.442695, %v2011_v61  ;;  %v2012_v0 = vadd.f32 %v2008_v62, %v5931_v15  ;;  %v6121_v47 = vld [vmem:[%s5658_s27 + $0x48] ss:$16 sps:$4 sm:$0xff]  }
 0x3e5   : > { %v1958_v54 = vpop.f32.mrf.mxu0  ;;  %v1999_v55 = vpop.f32.mrf.mxu1  ;;  %v6126_v49 = vld [vmem:[%s5658_s27 + $0x24] ss:$16 sps:$4 sm:$0xff]   ;;  %v6129_v50 = vld [vmem:[%s5658_s27 + $0x2c] ss:$16 sps:$4 sm:$0xff]   ;;  %v6134_v51 = vld [vmem:[%s5658_s27 + $0x20] ss:$16 sps:$4 sm:$0xff]   ;;  %v2320_v62 = vunpack.c.h.bf16 %v5891_v32 }
 0x3e6   : > { %4850 = vpow2.f32 %v4319_v52  ;;  %v4320_v58 = vmul.f32 -1.442695, %v2010_v53  ;;  %v6137_v52 = vld [vmem:[%s5658_s27 + $0x28] ss:$16 sps:$4 sm:$0xff]   ;;  %v6142_v53 = vld [vmem:[%s5658_s27 + $0x4] ss:$16 sps:$4 sm:$0xff]  }
 0x3e7   : > { %v6145_v54 = vld [vmem:[%s5658_s27 + $0xc] ss:$16 sps:$4 sm:$0xff]   ;;  %v6150_v55 = vld [vmem:[%s5658_s27] ss:$16 sps:$4 sm:$0xff]  }
 0x3e8   : > { %4852 = vpow2.f32 %v4320_v58  ;;  %v2319_v58 = vunpack.c.l.bf16 %v5891_v32  ;;  %v2322_v32 = vunpack.c.h.bf16 %v5893_v33 }
 0x3e9   : > { %4854 = vpow2.f32 %v4321_v63 }
 0x3ea   : > { %4856 = vtanh.f32 %v2012_v0 }
 0x3f3   : > { %v4851_v1 = vpop.eup %4850 }
 0x3f4   : > { %v2022_v3 = vadd.f32 1.0, %v4851_v1 }
 0x3f5   : > { %v4853_v4 = vpop.eup %4852 }
 0x3f6   : > { %4858 = vrcp.f32 %v2022_v3  ;;  %v2023_v5 = vadd.f32 1.0, %v4853_v4  ;;  %v4855_v7 = vpop.eup %4854 }
 0x3f7   : > { %v4857_v8 = vpop.eup %4856  ;;  %v2024_v14 = vadd.f32 1.0, %v4855_v7 }
 0x3f8   : > { %4860 = vrcp.f32 %v2023_v5 }
 0x3f9   : > { %4862 = vrcp.f32 %v2024_v14 }
 0x403   : > { %v4859_v9 = vpop.eup %4858 }
 0x404   : > { %v2033_v26 = vmul.f32 %v4859_v9, %v4857_v8 }
 0x405   : > { %v4861_v27 = vpop.eup %4860 }
 0x406   : > { %v2032_v25 = vmul.f32 %v4861_v27, %v5982_v10  ;;  %v4863_v6 = vpop.eup %4862  ;;  %v6073_v10 = vld [vmem:[%s5658_s27 + $0xa8] ss:$16 sps:$4 sm:$0xff]   ;;  %v2321_v27 = vunpack.c.l.bf16 %v5893_v33 }
 0x408   : > { %v6026_v20 = vadd.f32 %v2033_v26, %v2032_v25 }
 0x40a   : > { %4864 = vtanh.f32 %v6026_v20 }
 0x417   : > { %v4865_v13 = vpop.eup %4864 }
 0x418   : > { %v2036_v17 = vmul.f32 %v4865_v13, %v4863_v6 }
 0x41a   : > { %v2037_v35 = vpack.c.bf16 %v2036_v17, %v2036_v17 }
 0x41c   : > { %2039 = vst [vmem:[#allocation3 + $0x8] sm:$0xf] %v2037_v35  ;;  %2270 = vmatmul.mubr.bf16.vlgmr.msra.gmra.mxu0 %v2037_v35  ;;  %2311 = vmatmul.mubr.bf16.vlgmr.msra.gmra.mxu1 %v2037_v35 }
 0x41d   : > { %2587 = vmatprep.mubr.bf16.mxu0 %v6482_v31  ;;  %2628 = vmatprep.mubr.bf16.mxu1 %v6482_v31 }
 0x41e   : > { %2556 = vmatpush1.bf16.msra.mxu0 %v6038_v19  ;;  %2597 = vmatpush1.bf16.msra.mxu1 %v6041_v24 }
 0x41f   : > { %2557 = vmatprep.subr.bf16.mxu0 %v6048_v57  ;;  %2598 = vmatprep.subr.bf16.mxu1 %v6051_v11 }
 0x422   : > { %2558 = vmatpush1.bf16.msra.mxu0 %v6054_v18  ;;  %2599 = vmatpush1.bf16.msra.mxu1 %v6057_v36 }
 0x423   : > { %2559 = vmatprep.subr.bf16.mxu0 %v6064_v39  ;;  %2600 = vmatprep.subr.bf16.mxu1 %v6067_v21 }
 0x426   : > { %2560 = vmatpush1.bf16.msra.mxu0 %v6070_v16  ;;  %2601 = vmatpush1.bf16.msra.mxu1 %v6073_v10 }
 0x427   : > { %2561 = vmatprep.subr.bf16.mxu0 %v6080_v37  ;;  %2602 = vmatprep.subr.bf16.mxu1 %v6083_v30 }
 0x42a   : > { %2562 = vmatpush1.bf16.msra.mxu0 %v6086_v38  ;;  %2603 = vmatpush1.bf16.msra.mxu1 %v6089_v23 }
 0x42b   : > { %2563 = vmatprep.subr.bf16.mxu0 %v6094_v40  ;;  %2604 = vmatprep.subr.bf16.mxu1 %v6097_v41 }
 0x42e   : > { %2564 = vmatpush1.bf16.msra.mxu0 %v6102_v42  ;;  %2605 = vmatpush1.bf16.msra.mxu1 %v6105_v43 }
 0x42f   : > { %2565 = vmatprep.subr.bf16.mxu0 %v6110_v44  ;;  %2606 = vmatprep.subr.bf16.mxu1 %v6113_v45 }
 0x432   : > { %2566 = vmatpush1.bf16.msra.mxu0 %v6118_v46  ;;  %2607 = vmatpush1.bf16.msra.mxu1 %v6121_v47 }
 0x433   : > { %2567 = vmatprep.subr.bf16.mxu0 %v6126_v49  ;;  %2608 = vmatprep.subr.bf16.mxu1 %v6129_v50 }
 0x436   : > { %2568 = vmatpush1.bf16.msra.mxu0 %v6134_v51  ;;  %2609 = vmatpush1.bf16.msra.mxu1 %v6137_v52 }
 0x437   : > { %2569 = vmatprep.subr.bf16.mxu0 %v6142_v53  ;;  %2610 = vmatprep.subr.bf16.mxu1 %v6145_v54 }
 0x43a   : > { %2570 = vmatpush1.bf16.msra.mxu0 %v6150_v55  ;;  %2611 = vmatpush1.bf16.msra.mxu1 %v6153_v56 }
 0x43b   : > { %2873 = vmatprep.subr.bf16.mxu0 %v6032_v2  ;;  %2914 = vmatprep.subr.bf16.mxu1 %v6035_v34 }
 0x4dc   : > { %v2271_v59 = vpop.f32.mrf.mxu0  ;;  %v2312_v60 = vpop.f32.mrf.mxu1 }
 0x4dd   : > { %v2323_v61 = vadd.f32 %v2319_v58, %v2271_v59  ;;  %v2325_v25 = vadd.f32 %v2321_v27, %v2312_v60 }
 0x4de   : > { %v2273_v63 = vpop.f32.mrf.mxu0  ;;  %v2314_v0 = vpop.f32.mrf.mxu1 }
 0x4df   : > { %v2327_v1 = vadd.f32 %v2323_v61, %v5918_v12  ;;  %v2324_v3 = vadd.f32 %v2320_v62, %v2273_v63  ;;  %v2329_v6 = vadd.f32 %v2325_v25, %v5927_v29  ;;  %v2326_v13 = vadd.f32 %v2322_v32, %v2314_v0 }
 0x4e0   : > { %v2275_v4 = vpop.f32.mrf.mxu0  ;;  %v2316_v5 = vpop.f32.mrf.mxu1  ;;  %v2638_v32 = vunpack.c.h.bf16 %v5895_v48 }
 0x4e1   : > { %v4354_v7 = vmul.f32 -1.442695, %v2327_v1  ;;  %v2328_v8 = vadd.f32 %v2324_v3, %v5922_v28  ;;  %v4356_v17 = vmul.f32 -1.442695, %v2329_v6  ;;  %v2330_v35 = vadd.f32 %v2326_v13, %v5931_v15 }
 0x4e2   : > { %v2276_v9 = vpop.f32.mrf.mxu0  ;;  %v2317_v26 = vpop.f32.mrf.mxu1 }
 0x4e3   : > { %4866 = vpow2.f32 %v4354_v7  ;;  %v4355_v14 = vmul.f32 -1.442695, %v2328_v8 }
 0x4e5   : > { %4868 = vpow2.f32 %v4355_v14 }
 0x4e6   : > { %4870 = vpow2.f32 %v4356_v17 }
 0x4e7   : > { %4872 = vtanh.f32 %v2330_v35 }
 0x4f0   : > { %v4867_v58 = vpop.eup %4866 }
 0x4f1   : > { %v2340_v59 = vadd.f32 1.0, %v4867_v58 }
 0x4f2   : > { %v4869_v61 = vpop.eup %4868 }
 0x4f3   : > { %4874 = vrcp.f32 %v2340_v59  ;;  %v2341_v62 = vadd.f32 1.0, %v4869_v61  ;;  %v4871_v63 = vpop.eup %4870 }
 0x4f4   : > { %v4873_v1 = vpop.eup %4872  ;;  %v2342_v33 = vadd.f32 1.0, %v4871_v63 }
 0x4f5   : > { %4876 = vrcp.f32 %v2341_v62 }
 0x4f6   : > { %4878 = vrcp.f32 %v2342_v33 }
 0x500   : > { %v4875_v60 = vpop.eup %4874 }
 0x501   : > { %v2351_v3 = vmul.f32 %v4875_v60, %v4873_v1  ;;  %v6483_v60 = vld [vmem:[#allocation32_spill] sm:$0xff] }
 0x502   : > { %v4877_v4 = vpop.eup %4876 }
 0x503   : > { %v2350_v5 = vmul.f32 %v4877_v4, %v6026_v20  ;;  %v4879_v7 = vpop.eup %4878  ;;  %v2637_v20 = vunpack.c.l.bf16 %v5895_v48  ;;  %v2640_v48 = vunpack.c.h.bf16 %v6483_v60 }
 0x505   : > { %v6170_v0 = vadd.f32 %v2351_v3, %v2350_v5  ;;  %v2639_v3 = vunpack.c.l.bf16 %v6483_v60 }
 0x507   : > { %4880 = vtanh.f32 %v6170_v0 }
 0x514   : > { %v4881_v8 = vpop.eup %4880 }
 0x515   : > { %v2354_v9 = vmul.f32 %v4881_v8, %v4879_v7 }
 0x517   : > { %v2355_v26 = vpack.c.bf16 %v2354_v9, %v2354_v9 }
 0x519   : > { %2357 = vst [vmem:[#allocation3 + $0xc] sm:$0xf] %v2355_v26  ;;  %2588 = vmatmul.mubr.bf16.vlgmr.msra.gmra.mxu0 %v2355_v26  ;;  %2629 = vmatmul.mubr.bf16.vlgmr.msra.gmra.mxu1 %v2355_v26 }
 0x51a   : > { %2874 = vmatpush1.bf16.msra.mxu0 %v6038_v19  ;;  %2915 = vmatpush1.bf16.msra.mxu1 %v6041_v24 }
 0x51b   : > { %2875 = vmatprep.subr.bf16.mxu0 %v6048_v57  ;;  %2916 = vmatprep.subr.bf16.mxu1 %v6051_v11 }
 0x51c   : > { %2905 = vmatprep.mubr.bf16.mxu0 %v6482_v31  ;;  %2946 = vmatprep.mubr.bf16.mxu1 %v6482_v31 }
 0x51e   : > { %2876 = vmatpush1.bf16.msra.mxu0 %v6054_v18  ;;  %2917 = vmatpush1.bf16.msra.mxu1 %v6057_v36 }
 0x51f   : > { %2877 = vmatprep.subr.bf16.mxu0 %v6064_v39  ;;  %2918 = vmatprep.subr.bf16.mxu1 %v6067_v21 }
 0x522   : > { %2878 = vmatpush1.bf16.msra.mxu0 %v6070_v16  ;;  %2919 = vmatpush1.bf16.msra.mxu1 %v6073_v10 }
 0x523   : > { %2879 = vmatprep.subr.bf16.mxu0 %v6080_v37  ;;  %2920 = vmatprep.subr.bf16.mxu1 %v6083_v30 }
 0x526   : > { %2880 = vmatpush1.bf16.msra.mxu0 %v6086_v38  ;;  %2921 = vmatpush1.bf16.msra.mxu1 %v6089_v23 }
 0x527   : > { %2881 = vmatprep.subr.bf16.mxu0 %v6094_v40  ;;  %2922 = vmatprep.subr.bf16.mxu1 %v6097_v41 }
 0x52a   : > { %2882 = vmatpush1.bf16.msra.mxu0 %v6102_v42  ;;  %2923 = vmatpush1.bf16.msra.mxu1 %v6105_v43 }
 0x52b   : > { %2883 = vmatprep.subr.bf16.mxu0 %v6110_v44  ;;  %2924 = vmatprep.subr.bf16.mxu1 %v6113_v45 }
 0x52e   : > { %2884 = vmatpush1.bf16.msra.mxu0 %v6118_v46  ;;  %2925 = vmatpush1.bf16.msra.mxu1 %v6121_v47 }
 0x52f   : > { %2885 = vmatprep.subr.bf16.mxu0 %v6126_v49  ;;  %2926 = vmatprep.subr.bf16.mxu1 %v6129_v50 }
 0x532   : > { %2886 = vmatpush1.bf16.msra.mxu0 %v6134_v51  ;;  %2927 = vmatpush1.bf16.msra.mxu1 %v6137_v52 }
 0x533   : > { %2887 = vmatprep.subr.bf16.mxu0 %v6142_v53  ;;  %2928 = vmatprep.subr.bf16.mxu1 %v6145_v54 }
 0x536   : > { %2888 = vmatpush1.bf16.msra.mxu0 %v6150_v55  ;;  %2929 = vmatpush1.bf16.msra.mxu1 %v6153_v56 }
 0x537   : > { %3191 = vmatprep.subr.bf16.mxu0 %v6032_v2  ;;  %3232 = vmatprep.subr.bf16.mxu1 %v6035_v34 }
 0x5d9   : > { %v2589_v27 = vpop.f32.mrf.mxu0  ;;  %v2630_v14 = vpop.f32.mrf.mxu1 }
 0x5da   : > { %v2641_v25 = vadd.f32 %v2637_v20, %v2589_v27  ;;  %v2643_v33 = vadd.f32 %v2639_v3, %v2630_v14 }
 0x5db   : > { %v2591_v6 = vpop.f32.mrf.mxu0  ;;  %v2632_v13 = vpop.f32.mrf.mxu1 }
 0x5dc   : > { %v2645_v17 = vadd.f32 %v2641_v25, %v5918_v12  ;;  %v2642_v35 = vadd.f32 %v2638_v32, %v2591_v6  ;;  %v2647_v5 = vadd.f32 %v2643_v33, %v5927_v29  ;;  %v2644_v7 = vadd.f32 %v2640_v48, %v2632_v13 }
 0x5dd   : > { %v2593_v58 = vpop.f32.mrf.mxu0  ;;  %v2634_v59 = vpop.f32.mrf.mxu1 }
 0x5de   : > { %v4389_v61 = vmul.f32 -1.442695, %v2645_v17  ;;  %v2646_v62 = vadd.f32 %v2642_v35, %v5922_v28  ;;  %v4391_v8 = vmul.f32 -1.442695, %v2647_v5  ;;  %v2648_v9 = vadd.f32 %v2644_v7, %v5931_v15 }
 0x5df   : > { %v2594_v63 = vpop.f32.mrf.mxu0  ;;  %v2635_v1 = vpop.f32.mrf.mxu1 }
 0x5e0   : > { %4882 = vpow2.f32 %v4389_v61  ;;  %v4390_v4 = vmul.f32 -1.442695, %v2646_v62 }
 0x5e2   : > { %4884 = vpow2.f32 %v4390_v4 }
 0x5e3   : > { %4886 = vpow2.f32 %v4391_v8 }
 0x5e4   : > { %4888 = vtanh.f32 %v2648_v9 }
 0x5ed   : > { %v4883_v26 = vpop.eup %4882 }
 0x5ee   : > { %v2658_v20 = vadd.f32 1.0, %v4883_v26 }
 0x5ef   : > { %v4885_v27 = vpop.eup %4884 }
 0x5f0   : > { %4890 = vrcp.f32 %v2658_v20  ;;  %v2659_v25 = vadd.f32 1.0, %v4885_v27  ;;  %v4887_v32 = vpop.eup %4886 }
 0x5f1   : > { %v4889_v6 = vpop.eup %4888  ;;  %v2660_v58 = vadd.f32 1.0, %v4887_v32 }
 0x5f2   : > { %4892 = vrcp.f32 %v2659_v25 }
 0x5f3   : > { %4894 = vrcp.f32 %v2660_v58 }
 0x5fd   : > { %v4891_v14 = vpop.eup %4890 }
 0x5fe   : > { %v2669_v17 = vmul.f32 %v4891_v14, %v4889_v6 }
 0x5ff   : > { %v4893_v35 = vpop.eup %4892 }
 0x600   : > { %v2668_v59 = vmul.f32 %v4893_v35, %v6170_v0  ;;  %v4895_v61 = vpop.eup %4894  ;;  %v6484_v0 = vld [vmem:[#allocation33_spill] sm:$0xff] }
 0x601   : > { %v2955_v60 = vunpack.c.l.bf16 %v6484_v0  ;;  %v2956_v48 = vunpack.c.h.bf16 %v6484_v0 }
 0x602   : > { %v6216_v13 = vadd.f32 %v2669_v17, %v2668_v59 }
 0x604   : > { %4896 = vtanh.f32 %v6216_v13 }
 0x611   : > { %v4897_v62 = vpop.eup %4896 }
 0x612   : > { %v2672_v63 = vmul.f32 %v4897_v62, %v4895_v61 }
 0x614   : > { %v2673_v1 = vpack.c.bf16 %v2672_v63, %v2672_v63 }
 0x616   : > { %2675 = vst [vmem:[#allocation3 + $0x10] sm:$0xf] %v2673_v1  ;;  %2906 = vmatmul.mubr.bf16.vlgmr.msra.gmra.mxu0 %v2673_v1  ;;  %2947 = vmatmul.mubr.bf16.vlgmr.msra.gmra.mxu1 %v2673_v1 }
 0x617   : > { %3192 = vmatpush1.bf16.msra.mxu0 %v6038_v19  ;;  %3233 = vmatpush1.bf16.msra.mxu1 %v6041_v24 }
 0x618   : > { %3193 = vmatprep.subr.bf16.mxu0 %v6048_v57  ;;  %3234 = vmatprep.subr.bf16.mxu1 %v6051_v11 }
 0x619   : > { %3223 = vmatprep.mubr.bf16.mxu0 %v6482_v31  ;;  %3264 = vmatprep.mubr.bf16.mxu1 %v6482_v31 }
 0x61b   : > { %3194 = vmatpush1.bf16.msra.mxu0 %v6054_v18  ;;  %3235 = vmatpush1.bf16.msra.mxu1 %v6057_v36 }
 0x61c   : > { %3195 = vmatprep.subr.bf16.mxu0 %v6064_v39  ;;  %3236 = vmatprep.subr.bf16.mxu1 %v6067_v21 }
 0x61f   : > { %3196 = vmatpush1.bf16.msra.mxu0 %v6070_v16  ;;  %3237 = vmatpush1.bf16.msra.mxu1 %v6073_v10 }
 0x620   : > { %3197 = vmatprep.subr.bf16.mxu0 %v6080_v37  ;;  %3238 = vmatprep.subr.bf16.mxu1 %v6083_v30 }
 0x623   : > { %3198 = vmatpush1.bf16.msra.mxu0 %v6086_v38  ;;  %3239 = vmatpush1.bf16.msra.mxu1 %v6089_v23 }
 0x624   : > { %3199 = vmatprep.subr.bf16.mxu0 %v6094_v40  ;;  %3240 = vmatprep.subr.bf16.mxu1 %v6097_v41 }
 0x627   : > { %3200 = vmatpush1.bf16.msra.mxu0 %v6102_v42  ;;  %3241 = vmatpush1.bf16.msra.mxu1 %v6105_v43 }
 0x628   : > { %3201 = vmatprep.subr.bf16.mxu0 %v6110_v44  ;;  %3242 = vmatprep.subr.bf16.mxu1 %v6113_v45 }
 0x62b   : > { %3202 = vmatpush1.bf16.msra.mxu0 %v6118_v46  ;;  %3243 = vmatpush1.bf16.msra.mxu1 %v6121_v47 }
 0x62c   : > { %3203 = vmatprep.subr.bf16.mxu0 %v6126_v49  ;;  %3244 = vmatprep.subr.bf16.mxu1 %v6129_v50 }
 0x62f   : > { %3204 = vmatpush1.bf16.msra.mxu0 %v6134_v51  ;;  %3245 = vmatpush1.bf16.msra.mxu1 %v6137_v52 }
 0x630   : > { %3205 = vmatprep.subr.bf16.mxu0 %v6142_v53  ;;  %3246 = vmatprep.subr.bf16.mxu1 %v6145_v54 }
 0x633   : > { %3206 = vmatpush1.bf16.msra.mxu0 %v6150_v55  ;;  %3247 = vmatpush1.bf16.msra.mxu1 %v6153_v56 }
 0x634   : > { %3509 = vmatprep.subr.bf16.mxu0 %v6032_v2  ;;  %3550 = vmatprep.subr.bf16.mxu1 %v6035_v34  ;;  %v6485_v34 = vld [vmem:[#allocation34_spill] sm:$0xff] }
 0x635   : > { %v2957_v6 = vunpack.c.l.bf16 %v6485_v34  ;;  %v2958_v35 = vunpack.c.h.bf16 %v6485_v34 }
 0x6d6   : > { %v2907_v3 = vpop.f32.mrf.mxu0  ;;  %v2948_v4 = vpop.f32.mrf.mxu1 }
 0x6d7   : > { %v2959_v33 = vadd.f32 %v2955_v60, %v2907_v3  ;;  %v2961_v17 = vadd.f32 %v2957_v6, %v2948_v4 }
 0x6d8   : > { %v2909_v5 = vpop.f32.mrf.mxu0  ;;  %v2950_v7 = vpop.f32.mrf.mxu1 }
 0x6d9   : > { %v2963_v8 = vadd.f32 %v2959_v33, %v5918_v12  ;;  %v2960_v9 = vadd.f32 %v2956_v48, %v2909_v5  ;;  %v2965_v58 = vadd.f32 %v2961_v17, %v5927_v29  ;;  %v2962_v59 = vadd.f32 %v2958_v35, %v2950_v7 }
 0x6da   : > { %v2911_v26 = vpop.f32.mrf.mxu0  ;;  %v2952_v20 = vpop.f32.mrf.mxu1 }
 0x6db   : > { %v4424_v27 = vmul.f32 -1.442695, %v2963_v8  ;;  %v2964_v25 = vadd.f32 %v2960_v9, %v5922_v28  ;;  %v4426_v61 = vmul.f32 -1.442695, %v2965_v58  ;;  %v2966_v62 = vadd.f32 %v2962_v59, %v5931_v15 }
 0x6dc   : > { %v2912_v2 = vpop.f32.mrf.mxu0  ;;  %v2953_v32 = vpop.f32.mrf.mxu1 }
 0x6dd   : > { %4898 = vpow2.f32 %v4424_v27  ;;  %v4425_v14 = vmul.f32 -1.442695, %v2964_v25 }
 0x6df   : > { %4900 = vpow2.f32 %v4425_v14 }
 0x6e0   : > { %4902 = vpow2.f32 %v4426_v61  ;;  %v6488_v61 = vld [vmem:[#allocation37_spill] sm:$0xff] }
 0x6e1   : > { %4904 = vtanh.f32 %v2966_v62  ;;  %v3591_v62 = vunpack.c.l.bf16 %v6488_v61 }
 0x6ea   : > { %v4899_v63 = vpop.eup %4898 }
 0x6eb   : > { %v2976_v1 = vadd.f32 1.0, %v4899_v63 }
 0x6ec   : > { %v4901_v0 = vpop.eup %4900 }
 0x6ed   : > { %4906 = vrcp.f32 %v2976_v1  ;;  %v2977_v60 = vadd.f32 1.0, %v4901_v0  ;;  %v4903_v3 = vpop.eup %4902 }
 0x6ee   : > { %v4905_v33 = vpop.eup %4904  ;;  %v2978_v8 = vadd.f32 1.0, %v4903_v3 }
 0x6ef   : > { %4908 = vrcp.f32 %v2977_v60  ;;  %v3592_v60 = vunpack.c.h.bf16 %v6488_v61 }
 0x6f0   : > { %4910 = vrcp.f32 %v2978_v8 }
 0x6fa   : > { %v4907_v4 = vpop.eup %4906 }
 0x6fb   : > { %v2987_v48 = vmul.f32 %v4907_v4, %v4905_v33 }
 0x6fc   : > { %v4909_v5 = vpop.eup %4908 }
 0x6fd   : > { %v2986_v9 = vmul.f32 %v4909_v5, %v6216_v13  ;;  %v4911_v26 = vpop.eup %4910 }
 0x6ff   : > { %v6262_v7 = vadd.f32 %v2987_v48, %v2986_v9 }
 0x701   : > { %4912 = vtanh.f32 %v6262_v7 }
 0x70e   : > { %v4913_v20 = vpop.eup %4912 }
 0x70f   : > { %v2990_v27 = vmul.f32 %v4913_v20, %v4911_v26 }
 0x711   : > { %v2991_v25 = vpack.c.bf16 %v2990_v27, %v2990_v27  ;;  %v6489_v27 = vld [vmem:[#allocation38_spill] sm:$0xff] }
 0x713   : > { %2993 = vst [vmem:[#allocation3 + $0x14] sm:$0xf] %v2991_v25  ;;  %3224 = vmatmul.mubr.bf16.vlgmr.msra.gmra.mxu0 %v2991_v25  ;;  %3265 = vmatmul.mubr.bf16.vlgmr.msra.gmra.mxu1 %v2991_v25  ;;  %v3593_v25 = vunpack.c.l.bf16 %v6489_v27 }
 0x714   : > { %3510 = vmatpush1.bf16.msra.mxu0 %v6038_v19  ;;  %3551 = vmatpush1.bf16.msra.mxu1 %v6041_v24 }
 0x715   : > { %3511 = vmatprep.subr.bf16.mxu0 %v6048_v57  ;;  %3552 = vmatprep.subr.bf16.mxu1 %v6051_v11 }
 0x716   : > { %3541 = vmatprep.mubr.bf16.mxu0 %v6482_v31  ;;  %3582 = vmatprep.mubr.bf16.mxu1 %v6482_v31  ;;  %v6486_v31 = vld [vmem:[#allocation35_spill] sm:$0xff] }
 0x717   : > { %v3273_v19 = vunpack.c.l.bf16 %v6486_v31 }
 0x718   : > { %3512 = vmatpush1.bf16.msra.mxu0 %v6054_v18  ;;  %3553 = vmatpush1.bf16.msra.mxu1 %v6057_v36  ;;  %v3274_v18 = vunpack.c.h.bf16 %v6486_v31 }
 0x719   : > { %3513 = vmatprep.subr.bf16.mxu0 %v6064_v39  ;;  %3554 = vmatprep.subr.bf16.mxu1 %v6067_v21 }
 0x71c   : > { %3514 = vmatpush1.bf16.msra.mxu0 %v6070_v16  ;;  %3555 = vmatpush1.bf16.msra.mxu1 %v6073_v10 }
 0x71d   : > { %3515 = vmatprep.subr.bf16.mxu0 %v6080_v37  ;;  %3556 = vmatprep.subr.bf16.mxu1 %v6083_v30 }
 0x720   : > { %3516 = vmatpush1.bf16.msra.mxu0 %v6086_v38  ;;  %3557 = vmatpush1.bf16.msra.mxu1 %v6089_v23 }
 0x721   : > { %3517 = vmatprep.subr.bf16.mxu0 %v6094_v40  ;;  %3558 = vmatprep.subr.bf16.mxu1 %v6097_v41  ;;  %v6487_v41 = vld [vmem:[#allocation36_spill] sm:$0xff] }
 0x724   : > { %3518 = vmatpush1.bf16.msra.mxu0 %v6102_v42  ;;  %3559 = vmatpush1.bf16.msra.mxu1 %v6105_v43  ;;  %v3275_v42 = vunpack.c.l.bf16 %v6487_v41 }
 0x725   : > { %3519 = vmatprep.subr.bf16.mxu0 %v6110_v44  ;;  %3560 = vmatprep.subr.bf16.mxu1 %v6113_v45  ;;  %v3276_v45 = vunpack.c.h.bf16 %v6487_v41 }
 0x728   : > { %3520 = vmatpush1.bf16.msra.mxu0 %v6118_v46  ;;  %3561 = vmatpush1.bf16.msra.mxu1 %v6121_v47 }
 0x729   : > { %3521 = vmatprep.subr.bf16.mxu0 %v6126_v49  ;;  %3562 = vmatprep.subr.bf16.mxu1 %v6129_v50 }
 0x72c   : > { %3522 = vmatpush1.bf16.msra.mxu0 %v6134_v51  ;;  %3563 = vmatpush1.bf16.msra.mxu1 %v6137_v52 }
 0x72d   : > { %3523 = vmatprep.subr.bf16.mxu0 %v6142_v53  ;;  %3564 = vmatprep.subr.bf16.mxu1 %v6145_v54 }
 0x730   : > { %3524 = vmatpush1.bf16.msra.mxu0 %v6150_v55  ;;  %3565 = vmatpush1.bf16.msra.mxu1 %v6153_v56 }
 0x7d3   : > { %v3225_v24 = vpop.f32.mrf.mxu0  ;;  %v3266_v57 = vpop.f32.mrf.mxu1 }
 0x7d4   : > { %v3277_v11 = vadd.f32 %v3273_v19, %v3225_v24  ;;  %v3279_v44 = vadd.f32 %v3275_v42, %v3266_v57  ;;  %v3594_v24 = vunpack.c.h.bf16 %v6489_v27 }
 0x7d5   : > { %v3227_v36 = vpop.f32.mrf.mxu0  ;;  %v3268_v39 = vpop.f32.mrf.mxu1 }
 0x7d6   : > { %v3281_v21 = vadd.f32 %v3277_v11, %v5918_v12  ;;  %v3278_v16 = vadd.f32 %v3274_v18, %v3227_v36  ;;  %v3283_v46 = vadd.f32 %v3279_v44, %v5927_v29  ;;  %v3280_v47 = vadd.f32 %v3276_v45, %v3268_v39 }
 0x7d7   : > { %v3229_v10 = vpop.f32.mrf.mxu0  ;;  %v3270_v37 = vpop.f32.mrf.mxu1 }
 0x7d8   : > { %v4459_v30 = vmul.f32 -1.442695, %v3281_v21  ;;  %v3282_v38 = vadd.f32 %v3278_v16, %v5922_v28  ;;  %v4461_v49 = vmul.f32 -1.442695, %v3283_v46  ;;  %v3284_v50 = vadd.f32 %v3280_v47, %v5931_v15 }
 0x7d9   : > { %v3230_v23 = vpop.f32.mrf.mxu0  ;;  %v3271_v40 = vpop.f32.mrf.mxu1 }
 0x7da   : > { %4914 = vpow2.f32 %v4459_v30  ;;  %v4460_v43 = vmul.f32 -1.442695, %v3282_v38 }
 0x7dc   : > { %4916 = vpow2.f32 %v4460_v43 }
 0x7dd   : > { %4918 = vpow2.f32 %v4461_v49 }
 0x7de   : > { %4920 = vtanh.f32 %v3284_v50 }
 0x7e7   : > { %v4915_v51 = vpop.eup %4914 }
 0x7e8   : > { %v3294_v52 = vadd.f32 1.0, %v4915_v51 }
 0x7e9   : > { %v4917_v53 = vpop.eup %4916 }
 0x7ea   : > { %4922 = vrcp.f32 %v3294_v52  ;;  %v3295_v54 = vadd.f32 1.0, %v4917_v53  ;;  %v4919_v55 = vpop.eup %4918 }
 0x7eb   : > { %v4921_v56 = vpop.eup %4920  ;;  %v3296_v34 = vadd.f32 1.0, %v4919_v55 }
 0x7ec   : > { %4924 = vrcp.f32 %v3295_v54 }
 0x7ed   : > { %4926 = vrcp.f32 %v3296_v34 }
 0x7f7   : > { %v4923_v13 = vpop.eup %4922 }
 0x7f8   : > { %v3305_v2 = vmul.f32 %v4923_v13, %v4921_v56 }
 0x7f9   : > { %v4925_v32 = vpop.eup %4924 }
 0x7fa   : > { %v3304_v6 = vmul.f32 %v4925_v32, %v6262_v7  ;;  %v4927_v17 = vpop.eup %4926 }
 0x7fc   : > { %v3306_v14 = vadd.f32 %v3305_v2, %v3304_v6 }
 0x7fe   : > { %4928 = vtanh.f32 %v3306_v14 }
 0x80b   : > { %v4929_v35 = vpop.eup %4928 }
 0x80c   : > { %v3308_v58 = vmul.f32 %v4929_v35, %v4927_v17 }
 0x80e   : > { %v3309_v59 = vpack.c.bf16 %v3308_v58, %v3308_v58 }
 0x810   : > { %3311 = vst [vmem:[#allocation3 + $0x18] sm:$0xf] %v3309_v59  ;;  %3542 = vmatmul.mubr.bf16.vlgmr.msra.gmra.mxu0 %v3309_v59  ;;  %3583 = vmatmul.mubr.bf16.vlgmr.msra.gmra.mxu1 %v3309_v59 }
 0x8d0   : > { %v3543_v63 = vpop.f32.mrf.mxu0  ;;  %v3584_v1 = vpop.f32.mrf.mxu1 }
 0x8d1   : > { %v3595_v0 = vadd.f32 %v3591_v62, %v3543_v63  ;;  %v3597_v19 = vadd.f32 %v3593_v25, %v3584_v1 }
 0x8d2   : > { %v3545_v3 = vpop.f32.mrf.mxu0  ;;  %v3586_v33 = vpop.f32.mrf.mxu1 }
 0x8d3   : > { %v3599_v4 = vadd.f32 %v3595_v0, %v5918_v12  ;;  %v3596_v48 = vadd.f32 %v3592_v60, %v3545_v3  ;;  %v3601_v57 = vadd.f32 %v3597_v19, %v5927_v29  ;;  %v3598_v11 = vadd.f32 %v3594_v24, %v3586_v33 }
 0x8d4   : > { %v3547_v5 = vpop.f32.mrf.mxu0  ;;  %v3588_v8 = vpop.f32.mrf.mxu1 }
 0x8d5   : > { %v4494_v9 = vmul.f32 -1.442695, %v3599_v4  ;;  %v3600_v7 = vadd.f32 %v3596_v48, %v5922_v28  ;;  %v4496_v12 = vmul.f32 -1.442695, %v3601_v57  ;;  %v3602_v18 = vadd.f32 %v3598_v11, %v5931_v15 }
 0x8d6   : > { %v3548_v26 = vpop.f32.mrf.mxu0  ;;  %v3589_v20 = vpop.f32.mrf.mxu1 }
 0x8d7   : > { %4930 = vpow2.f32 %v4494_v9  ;;  %v4495_v31 = vmul.f32 -1.442695, %v3600_v7 }
 0x8d9   : > { %4932 = vpow2.f32 %v4495_v31 }
 0x8da   : > { %4934 = vpow2.f32 %v4496_v12 }
 0x8db   : > { %4936 = vtanh.f32 %v3602_v18 }
 0x8e4   : > { %v4931_v36 = vpop.eup %4930 }
 0x8e5   : > { %v3612_v39 = vadd.f32 1.0, %v4931_v36 }
 0x8e6   : > { %v4933_v28 = vpop.eup %4932 }
 0x8e7   : > { %4938 = vrcp.f32 %v3612_v39  ;;  %v3613_v21 = vadd.f32 1.0, %v4933_v28  ;;  %v4935_v16 = vpop.eup %4934 }
 0x8e8   : > { %v4937_v10 = vpop.eup %4936  ;;  %v3614_v29 = vadd.f32 1.0, %v4935_v16 }
 0x8e9   : > { %4940 = vrcp.f32 %v3613_v21 }
 0x8ea   : > { %4942 = vrcp.f32 %v3614_v29 }
 0x8f4   : > { %v4939_v37 = vpop.eup %4938 }
 0x8f5   : > { %v3623_v30 = vmul.f32 %v4939_v37, %v4937_v10 }
 0x8f6   : > { %v4941_v38 = vpop.eup %4940 }
 0x8f7   : > { %v3622_v23 = vmul.f32 %v4941_v38, %v3306_v14  ;;  %v4943_v15 = vpop.eup %4942 }
 0x8f9   : > { %v3624_v40 = vadd.f32 %v3623_v30, %v3622_v23 }
 0x8fb   : > { %4944 = vtanh.f32 %v3624_v40  ;;  %3631 = vst [vmem:[%s558_s18] sm:$0xff] %v3624_v40 }
 0x908   : > { %v4945_v41 = vpop.eup %4944 }
 0x909   : > { %v3626_v42 = vmul.f32 %v4945_v41, %v4943_v15  ;;  %3635 = sbr.rel (%p4497_p13) target bundleno = 2562 (0xa02), region = 88 }
 0x90b   : > { %v3627_v43 = vpack.c.bf16 %v3626_v42, %v3626_v42  ;;  %3630 = vst [vmem:[%s551_s13] sm:$0xff] %v3626_v42 }
 0x90d   : > { %3629 = vst [vmem:[#allocation3 + $0x1c] sm:$0xf] %v3627_v43 }
 0x90e   : > { %v4946_v44 = vld [vmem:[#allocation15 + $0x74] ss:$8 sps:$4 sm:$0xff]   ;;  %v4948_v45 = vld [vmem:[#allocation15 + $0x70] ss:$8 sps:$4 sm:$0xff]   ;;  %v5316_v46 = vmov 0   ;;  %v4971_v17 = vld [vmem:[#allocation3 + $0x10] sm:$0xff]  }
 0x90f   : > { %3808 = vmatprep.mubr.bf16.mxu0 %v5316_v46  ;;  %3828 = vmatprep.mubr.bf16.mxu1 %v5316_v46  ;;  %v4949_v47 = vld [vmem:[#allocation15 + $0x64] ss:$8 sps:$4 sm:$0xff]   ;;  %v4951_v49 = vld [vmem:[#allocation15 + $0x60] ss:$8 sps:$4 sm:$0xff]   ;;  %v4952_v50 = vld [vmem:[#allocation15 + $0x54] ss:$8 sps:$4 sm:$0xff]  }
 0x910   : > { %3776 = vmatprep.subr.bf16.mxu0 %v4946_v44  ;;  %4545 = vmatprep.subr.bf16.mxu1 %v4946_v44  ;;  %v4954_v51 = vld [vmem:[#allocation15 + $0x50] ss:$8 sps:$4 sm:$0xff]   ;;  %v4955_v52 = vld [vmem:[#allocation15 + $0x44] ss:$8 sps:$4 sm:$0xff]   ;;  %v4957_v53 = vld [vmem:[#allocation15 + $0x40] ss:$8 sps:$4 sm:$0xff]  }
 0x911   : > { %3777 = vmatpush1.bf16.msra.mxu0 %v4948_v45  ;;  %4553 = vmatpush1.bf16.msra.mxu1 %v4948_v45  ;;  %v4958_v54 = vld [vmem:[#allocation15 + $0x34] ss:$8 sps:$4 sm:$0xff]   ;;  %v4960_v55 = vld [vmem:[#allocation15 + $0x30] ss:$8 sps:$4 sm:$0xff]   ;;  %v4961_v56 = vld [vmem:[#allocation15 + $0x24] ss:$8 sps:$4 sm:$0xff]  }
 0x912   : > { %3778 = vmatprep.subr.bf16.mxu0 %v4949_v47  ;;  %4546 = vmatprep.subr.bf16.mxu1 %v4949_v47  ;;  %v4963_v13 = vld [vmem:[#allocation15 + $0x20] ss:$8 sps:$4 sm:$0xff]   ;;  %v4964_v2 = vld [vmem:[#allocation15 + $0x14] ss:$8 sps:$4 sm:$0xff]   ;;  %v4966_v32 = vld [vmem:[#allocation15 + $0x10] ss:$8 sps:$4 sm:$0xff]  }
 0x913   : > { %v4967_v34 = vld [vmem:[#allocation15 + $0x4] ss:$8 sps:$4 sm:$0xff]   ;;  %v4969_v6 = vld [vmem:[#allocation15] ss:$8 sps:$4 sm:$0xff]   ;;  %v4970_v14 = vld [vmem:[#allocation3] sm:$0xff]   ;;  %v6491_v61 = vsub.s32 0, %v5903_v22 }
 0x914   : > { %v4972_v35 = vld [vmem:[#allocation3 + $0x8] sm:$0xff]   ;;  %v4973_v58 = vld [vmem:[#allocation3 + $0x18] sm:$0xff]   ;;  %v3660_v59 = vld [vmem:[%s6490_s22] sm:$0x3]  ;;  %v6492_v63 = vsub.s32 1, %v5903_v22 }
 0x915   : > { %3779 = vmatpush1.bf16.msra.mxu0 %v4951_v49  ;;  %4554 = vmatpush1.bf16.msra.mxu1 %v4951_v49  ;;  %v3665_v62 = vrot.slane %v3660_v59, %v6491_v61 }
 0x916   : > { %3780 = vmatprep.subr.bf16.mxu0 %v4952_v50  ;;  %4547 = vmatprep.subr.bf16.mxu1 %v4952_v50  ;;  %v3669_v1 = vrot.slane %v3660_v59, %v6492_v63 }
 0x919   : > { %3781 = vmatpush1.bf16.msra.mxu0 %v4954_v51  ;;  %4555 = vmatpush1.bf16.msra.mxu1 %v4954_v51 }
 0x91a   : > { %3782 = vmatprep.subr.bf16.mxu0 %v4955_v52  ;;  %4548 = vmatprep.subr.bf16.mxu1 %v4955_v52 }
 0x91d   : > { %3783 = vmatpush1.bf16.msra.mxu0 %v4957_v53  ;;  %4556 = vmatpush1.bf16.msra.mxu1 %v4957_v53 }
 0x91e   : > { %3784 = vmatprep.subr.bf16.mxu0 %v4958_v54  ;;  %4549 = vmatprep.subr.bf16.mxu1 %v4958_v54 }
 0x921   : > { %3785 = vmatpush1.bf16.msra.mxu0 %v4960_v55  ;;  %4557 = vmatpush1.bf16.msra.mxu1 %v4960_v55 }
 0x922   : > { %3786 = vmatprep.subr.bf16.mxu0 %v4961_v56  ;;  %4550 = vmatprep.subr.bf16.mxu1 %v4961_v56 }
 0x925   : > { %3787 = vmatpush1.bf16.msra.mxu0 %v4963_v13  ;;  %4558 = vmatpush1.bf16.msra.mxu1 %v4963_v13 }
 0x926   : > { %3788 = vmatprep.subr.bf16.mxu0 %v4964_v2  ;;  %4551 = vmatprep.subr.bf16.mxu1 %v4964_v2 }
 0x929   : > { %3789 = vmatpush1.bf16.msra.mxu0 %v4966_v32  ;;  %4559 = vmatpush1.bf16.msra.mxu1 %v4966_v32 }
 0x92a   : > { %3790 = vmatprep.subr.bf16.mxu0 %v4967_v34  ;;  %4552 = vmatprep.subr.bf16.mxu1 %v4967_v34 }
 0x92d   : > { %3791 = vmatpush1.bf16.msra.mxu0 %v4969_v6  ;;  %4560 = vmatpush1.bf16.msra.mxu1 %v4969_v6 }
 0x930   : > { %3809 = vmatmul.mubr.bf16.vlgmr.msra.gmra.mxu0 %v4970_v14  ;;  %3829 = vmatmul.mubr.bf16.vlgmr.msra.gmra.mxu1 %v4971_v17 }
 0x931   : > { %3818 = vmatprep.mubr.bf16.mxu0 %v5316_v46  ;;  %3838 = vmatprep.mubr.bf16.mxu1 %v5316_v46 }
 0x938   : > { %3819 = vmatmul.mubr.bf16.gmra.mxu0 %v4972_v35  ;;  %3839 = vmatmul.mubr.bf16.gmra.mxu1 %v4973_v58 }
 0x9f0   : > { %v3810_v0 = vpop.f32.mrf.mxu0  ;;  %v3830_v60 = vpop.f32.mrf.mxu1 }
 0x9f1   : > { %v3811_v3 = vadd.f32 %v3810_v0, %v3665_v62  ;;  %v3831_v33 = vadd.f32 %v3830_v60, %v3665_v62 }
 0x9f2   : > { %v3812_v4 = vpop.f32.mrf.mxu0  ;;  %v3832_v48 = vpop.f32.mrf.mxu1 }
 0x9f3   : > { %3849 = vst [vmem:[#allocation16] sm:$0xff] %v3811_v3  ;;  %3857 = vst [vmem:[#allocation16 + $0x40] sm:$0xff] %v3831_v33  ;;  %v3813_v5 = vadd.f32 %v3812_v4, %v3669_v1  ;;  %v3833_v8 = vadd.f32 %v3832_v48, %v3669_v1 }
 0x9f4   : > { %v3814_v9 = vpop.f32.mrf.mxu0  ;;  %v3834_v7 = vpop.f32.mrf.mxu1 }
 0x9f5   : > { %3850 = vst [vmem:[#allocation16 + $0x8] sm:$0xff] %v3813_v5  ;;  %3858 = vst [vmem:[#allocation16 + $0x48] sm:$0xff] %v3833_v8  ;;  %v3815_v26 = vadd.f32 %v3814_v9, %v3665_v62  ;;  %v3835_v20 = vadd.f32 %v3834_v7, %v3665_v62 }
 0x9f6   : > { %v3816_v27 = vpop.f32.mrf.mxu0  ;;  %v3836_v25 = vpop.f32.mrf.mxu1 }
 0x9f7   : > { %3851 = vst [vmem:[#allocation16 + $0x10] sm:$0xff] %v3815_v26  ;;  %3859 = vst [vmem:[#allocation16 + $0x50] sm:$0xff] %v3835_v20  ;;  %v3817_v22 = vadd.f32 %v3816_v27, %v3669_v1  ;;  %v3837_v31 = vadd.f32 %v3836_v25, %v3669_v1 }
 0x9f8   : > { %v3820_v19 = vpop.f32.mrf.mxu0  ;;  %v3840_v24 = vpop.f32.mrf.mxu1 }
 0x9f9   : > { %3852 = vst [vmem:[#allocation16 + $0x18] sm:$0xff] %v3817_v22  ;;  %3860 = vst [vmem:[#allocation16 + $0x58] sm:$0xff] %v3837_v31  ;;  %v3821_v57 = vadd.f32 %v3820_v19, %v3665_v62  ;;  %v3841_v11 = vadd.f32 %v3840_v24, %v3665_v62 }
 0x9fa   : > { %v3822_v12 = vpop.f32.mrf.mxu0  ;;  %v3842_v18 = vpop.f32.mrf.mxu1 }
 0x9fb   : > { %3853 = vst [vmem:[#allocation16 + $0x20] sm:$0xff] %v3821_v57  ;;  %3861 = vst [vmem:[#allocation16 + $0x60] sm:$0xff] %v3841_v11  ;;  %v3823_v36 = vadd.f32 %v3822_v12, %v3669_v1  ;;  %v3843_v39 = vadd.f32 %v3842_v18, %v3669_v1 }
 0x9fc   : > { %v3824_v28 = vpop.f32.mrf.mxu0  ;;  %v3844_v21 = vpop.f32.mrf.mxu1 }
 0x9fd   : > { %3854 = vst [vmem:[#allocation16 + $0x28] sm:$0xff] %v3823_v36  ;;  %3862 = vst [vmem:[#allocation16 + $0x68] sm:$0xff] %v3843_v39  ;;  %v3825_v16 = vadd.f32 %v3824_v28, %v3665_v62  ;;  %v3845_v10 = vadd.f32 %v3844_v21, %v3665_v62 }
 0x9fe   : > { %v3826_v37 = vpop.f32.mrf.mxu0  ;;  %v3846_v30 = vpop.f32.mrf.mxu1 }
 0x9ff   : > { %3855 = vst [vmem:[#allocation16 + $0x30] sm:$0xff] %v3825_v16  ;;  %3863 = vst [vmem:[#allocation16 + $0x70] sm:$0xff] %v3845_v10  ;;  %v3827_v38 = vadd.f32 %v3826_v37, %v3669_v1  ;;  %v3847_v29 = vadd.f32 %v3846_v30, %v3669_v1 }
 0xa01   : > { %3856 = vst [vmem:[#allocation16 + $0x38] sm:$0xff] %v3827_v38  ;;  %3864 = vst [vmem:[#allocation16 + $0x78] sm:$0xff] %v3847_v29 }
 0xa02 PF: > { %s6493_s1 = sld [smem:[#allocation31_spill]]  ;;  %s4521_s9 = sshll.u32 %s5396_s17, 7 }
 0xa03   : > { %s6494_s23 = sld [smem:[#allocation43_spill]]  ;;  %s3897_s6 = sshll.u32 %s551_s13, 4  ;;  %s3898_s6 = int_to_ptr.vmem [resolvable:$true] %s3897_s6 }
 0xa04   : > { %s3866_s10 = scalar_lea.sflag [#allocation18], %s5639_s20  ;;  %s5166_s21 = scalar_lea.vmem %s3898_s6, 128 }
 0xa05   : > { %p5167_p8 = scmp.ne.s32.totalorder %s3898_s6, %s5166_s21  ;;  %s5317_s7 = smov [#allocation17]  }
 0xa06   : > { %s5170_s11 = sshll.u32 %s5317_s7, 4  ;;  %s5171_s11 = int_to_ptr.vmem [resolvable:$false] %s5170_s11 }
 0xa07   : > { %s5172_s26 = scalar_lea.vmem %s5171_s11, 256  ;;  %p5173_p9 = scmp.lt.s32.totalorder %s3898_s6, %s5171_s11 }
 0xa08   : > { %p6495_p1 = scmp.ne.s32.totalorder %s6493_s1, 0  ;;  %p5174_p11 = scmp.lt.s32.totalorder %s5172_s26, %s5166_s21 }
 0xa09   : > { %s3895_s29 = scalar_lea.hbm %s6494_s23, %s4521_s9 }
 0xa0a   : > { %p5168_p2 = pnand %p5167_p8, %p6495_p1  ;;  %p5175_p12 = por %p5174_p11, %p5173_p9 }
 0xa0c   : > { %p5169_p4 = pneg %p5168_p2 }
 0xa0e   : > { %p5176_p6 = pnand %p5175_p12, %p5169_p4 }
 0xa10   : > { %5179 = shalt.err (!%p5176_p6)
}
 0xa11   : > { %s5180_s15 = scalar_lea.hbm %s3895_s29, 128  ;;  %s5184_s25 = scalar_lea.hbm %s6494_s23, 384 }
 0xa12   : > { %p5181_p0 = scmp.ne.s32.totalorder %s3895_s29, %s5180_s15  ;;  %p5185_p3 = scmp.lt.s32.totalorder %s3895_s29, %s6494_s23 }
 0xa13   : > { %p5186_p5 = scmp.lt.s32.totalorder %s5184_s25, %s5180_s15 }
 0xa14   : > { %p5182_p10 = pnand %p5181_p0, %p6495_p1 }
 0xa15   : > { %p5187_p13 = por %p5186_p5, %p5185_p3 }
 0xa16   : > { %p5183_p7 = pneg %p5182_p10 }
 0xa18   : > { %p5188_p8 = pnand %p5187_p13, %p5183_p7 }
 0xa1a   : > { %5191 = shalt.err (!%p5188_p8)
}
 0xa1b   : > { %4581 = dma.vmem_to_hbm [thread:$0]  (%p6495_p1), %s3898_s6, 128, %s3895_s29, %s3866_s10  }
 0xa1c   : > { %s5318_s12 = smov [#allocation16]   ;;  %p6496_p4 = scmp.eq.s32.totalorder %s5396_s17, 2 }
 0xa1d   : > { %s3881_s22 = sshll.u32 %s5318_s12, 4  ;;  %s3882_s22 = int_to_ptr.vmem [resolvable:$true] %s3881_s22 }
 0xa1e   : > { %s5192_s28 = scalar_lea.vmem %s3882_s22, 2048  ;;  %p5199_p12 = scmp.lt.s32.totalorder %s3882_s22, %s3882_s22 }
 0xa1f   : > { %p5193_p2 = scmp.ne.s32.totalorder %s3882_s22, %s5192_s28  ;;  %p5200_p6 = scmp.lt.s32.totalorder %s5192_s28, %s5192_s28 }
 0xa21   : > { %p5194_p9 = pnand %p5193_p2, %p6496_p4  ;;  %p5201_p0 = por %p5200_p6, %p5199_p12 }
 0xa23   : > { %p5195_p11 = pneg %p5194_p9 }
 0xa25   : > { %p5202_p10 = pnand %p5201_p0, %p5195_p11 }
 0xa27   : > { %5205 = shalt.err (!%p5202_p10)
}
 0xa28   : > { %s5319_s24 = smov 256   ;;  %s5320_s21 = smov 16  }
 0xa29   : > { %p6497_p7 = pmov %p6496_p4  ;;  %s6498_s7 = sld [smem:[#allocation42_spill]] }
 0xa2a   : > { %s6499_s15 = sld [smem:[#allocation44_spill]]  ;;  %s3910_s25 = sshll.u32 %s558_s18, 4  ;;  %s3911_s25 = int_to_ptr.vmem [resolvable:$true] %s3910_s25 }
 0xa2b   : > { %s5216_s13 = scalar_lea.vmem %s3911_s25, 128  ;;  %s5321_s19 = smov [#allocation19]  }
 0xa2c   : > { %p5217_p3 = scmp.ne.s32.totalorder %s3911_s25, %s5216_s13  ;;  %s5220_s12 = sshll.u32 %s5321_s19, 4  ;;  %s5221_s12 = int_to_ptr.vmem [resolvable:$false] %s5220_s12 }
 0xa2d   : > { %s5222_s28 = scalar_lea.vmem %s5221_s12, 256  ;;  %p5223_p8 = scmp.lt.s32.totalorder %s3911_s25, %s5221_s12 }
 0xa2e   : > { %p5218_p5 = pnand %p5217_p3, %p6495_p1  ;;  %p5224_p2 = scmp.lt.s32.totalorder %s5222_s28, %s5216_s13 }
 0xa2f   : > { %4580 = dma.vmem_to_hbm [thread:$0]  (%p6497_p7), %s3882_s22, 2048, %s6498_s7, [#allocation6], %s5319_s24, %s5319_s24, %s5320_s21  }
 0xa30   : > { %s6500_s27 = smov %s6499_s15  ;;  %s3908_s30 = scalar_lea.hbm %s6499_s15, %s4521_s9 }
 0xa31   : > { %p5219_p13 = pneg %p5218_p5  ;;  %p5225_p4 = por %p5224_p2, %p5223_p8 }
 0xa33   : > { %p5226_p9 = pnand %p5225_p4, %p5219_p13 }
 0xa35   : > { %5229 = shalt.err (!%p5226_p9)
}
 0xa36   : > { %s5230_s22 = scalar_lea.hbm %s3908_s30, 128  ;;  %s5234_s9 = scalar_lea.hbm %s6500_s27, 384 }
 0xa37   : > { %p5231_p11 = scmp.ne.s32.totalorder %s3908_s30, %s5230_s22  ;;  %p5235_p0 = scmp.lt.s32.totalorder %s3908_s30, %s6500_s27 }
 0xa38   : > { %p5236_p10 = scmp.lt.s32.totalorder %s5234_s9, %s5230_s22 }
 0xa39   : > { %p5232_p12 = pnand %p5231_p11, %p6495_p1 }
 0xa3a   : > { %p5237_p7 = por %p5236_p10, %p5235_p0 }
 0xa3b   : > { %p5233_p6 = pneg %p5232_p12 }
 0xa3d   : > { %p5238_p3 = pnand %p5237_p7, %p5233_p6 }
 0xa3f   : > { %5241 = shalt.err (!%p5238_p3)
}
 0xa40   : > { %4582 = dma.vmem_to_hbm [thread:$0]  (%p6495_p1), %s3911_s25, 128, %s3908_s30, %s3866_s10  }
 0xa41   : > { %p6501_p5 = scmp.eq.s32.totalorder %s5396_s17, 2 }
 0xa43   : > { %5279 = dma.done.wait (%p6501_p5), [#allocation6], 2048   ;;  %p6502_p13 = pmov %p6501_p5 }
 0xa45   : > { %5281 = vsyncadd (%p6502_p13), [#allocation6], 4294965248 }
 0xa46 PF: > { %s6503_s29 = sld [smem:[#allocation28_spill]]  ;;  %p4624_p8 = scmp.ge.s32.totalorder %s5300_s16, 2 }
 0xa47   : > { %s6504_s6 = sadd.s32 4294967294, %s5300_s16  }
 0xa48   : > { %s3926_s7 = sand.u32 1, %s6504_s6  }
 0xa49   : > { %s3927_s1 = scalar_lea.sflag [#allocation18], %s3926_s7 }
 0xa4c   : > { %p6505_p2 = scmp.ne.s32.totalorder %s6503_s29, 0 }
 0xa4e   : > { %p4611_p4 = pnand %p4624_p8, %p6505_p2 }
 0xa50   : > { %p4612_p9 = pneg %p4611_p4 }
 0xa52   : > { %5283 = dma.done.wait (%p4612_p9), %s3927_s1, 256  }
 0xa53   : > { %5285 = vsyncadd (%p4612_p9), %s3927_s1, 4294967040  ;;  %s6506_s16 = sld [smem:[#allocation29_spill]]  ;;  %s6509_s13 = smov %s5292_s14 }
 0xa54   : > { %s6507_s20 = sld [smem:[#allocation27_spill]] }
 0xa55   : > { %s6508_s15 = sld [smem:[#allocation30_spill]] }
 0xa59   : > { %p32_p1 = scmp.ge.s32.totalorder %s6506_s16, 5  }
 0xa5a   : > { %s6510_s14 = smov %s6507_s20 }
 0xa5b   :  { %34 = sbr.rel (!%p32_p1) target bundleno = 18 (0x12), region = 201 }
 0xa60   :  { %3941 = vsyncpa [#allocation5], 1 }
 0xa61   :  { %3943 = vsyncpa [#allocation5 + $0x1], 1 }
 0xa62   :  { %3944 = vsyncpa [#allocation8], 1 }
 0xa63   :  { %3946 = vsyncpa [#allocation8 + $0x1], 1 }
 0xa64   :  { %3947 = vsyncpa [#allocation11], 1 }
 0xa65   :  { %3949 = vsyncpa [#allocation11 + $0x1], 1 }
 0xa66   :  { %3950 = vsyncpa [#allocation14], 1 }
 0xa67   :  { %3952 = vsyncpa [#allocation14 + $0x1], 1 }
 0xa68   :  { %3953 = vsyncpa [#allocation6], 1 }
 0xa69   :  { %3955 = vsyncpa [#allocation6 + $0x1], 1 }
 0xa6a   :  { %3956 = vsyncpa [#allocation18], 1 }
 0xa6b   :  { %3958 = vsyncpa [#allocation18 + $0x1], 1 }

</bundles_post_ra>
